<compile_context>
chip_gen: v5e
topology: v5e:2x2
jax: 0.10.0
libtpu: 0.0.40
codegen_flags: <defaults>
</compile_context>

<pallas_src>
import math

import jax
import jax.numpy as jnp
from jax import lax
from jax.experimental import pallas as pl
from jax.experimental.pallas import tpu as pltpu  # noqa: F401  (kept for parity; no scratch needed anymore)

# ---------------- config (small, self-consistent Electra config) ----------------
B, S = 2, 16          # batch, sequence length
BS = B * S            # 32 flattened tokens
HIDDEN = 64           # config.hidden_size (== embedding_size, no projection)
N_HEADS = 4
HEAD_DIM = HIDDEN // N_HEADS          # 16
PACK = N_HEADS * BS                   # 128 — packed (head, key) lane axis
INTER = 128           # config.intermediate_size
N_LAYERS = 2          # config.num_hidden_layers
VOCAB = 128
MAX_POS = 64
LN_EPS = 1e-12

# dot_general dims for A @ B^T — lets Mosaic fold the transpose into the MXU push.
_BT = (((1,), (1,)), ((), ()))


def _gelu(x):
    # TODO(synk): HF get_activation("gelu") is erf-based; tanh approximation is
    # used for robust Mosaic lowering (~1e-3 relative difference).
    return jax.nn.gelu(x, approximate=True)


def _layernorm(x, g, b):
    mu = jnp.mean(x, axis=-1, keepdims=True)
    var = jnp.mean(jnp.square(x - mu), axis=-1, keepdims=True)
    return (x - mu) * jax.lax.rsqrt(var + LN_EPS) * g + b


# ---------------- single fused forward kernel ----------------
def fused_electra_kernel(emb_ref, bias_ref, bdmask_ref, mask_ref, ids_ref, fake_ref,
                         emb_ln_ref,
                         wqkv_ref, bqkv_ref, wo_ref, w1_ref, bi1_ref, w2_ref, vecs_ref,
                         wd_ref, bd_ref, wp_ref, bp_ref,
                         logits_ref, hidden_ref, loss_ref):
    f32, bf16 = jnp.float32, jnp.bfloat16

    # ---- embeddings: LayerNorm on the pre-flattened [BS, H] slab ----
    x = _layernorm(emb_ref[...].astype(f32), emb_ln_ref[0:1, :], emb_ln_ref[1:2, :])

    attn_bias = bias_ref[...]      # [BS, PACK] additive key/block mask, head-tiled
    bd_mask = bdmask_ref[...]      # [PACK, H]  block-diagonal head selector (0/1 f32)

    # ---- encoder layers (static unroll; stacked weights stay resident in VMEM) ----
    for l in range(N_LAYERS):
        vecs = vecs_ref[l]                         # [6, H]: bo, g1, b1, bi2, g2, b2
        qkv = (jnp.dot(x.astype(bf16), wqkv_ref[l],
                       preferred_element_type=f32) + bqkv_ref[l])       # [BS, 3H]
        # Q already carries 1/sqrt(head_dim): folded into wqkv/bqkv at init.
        q_bf = qkv[:, :HIDDEN].astype(bf16)                             # [BS, H]

        # Pack all heads into one lane-dense matmul pair: replicate K / V along
        # the packed (head, key) axis and zero the off-head blocks, so
        #   scores[:, h*BS + j]        = Q_h(i) . K_h(j)     (one [32,64]@[64,128]^T)
        #   ctx[:, h*HD:(h+1)*HD]      = P_h @ V_h           (one [32,128]@[128,64])
        k_bd = (jnp.concatenate([qkv[:, HIDDEN:2 * HIDDEN]] * N_HEADS, axis=0)
                * bd_mask).astype(bf16)                                 # [PACK, H]
        v_bd = (jnp.concatenate([qkv[:, 2 * HIDDEN:]] * N_HEADS, axis=0)
                * bd_mask).astype(bf16)                                 # [PACK, H]

        scores = lax.dot_general(q_bf, k_bd, _BT,
                                 preferred_element_type=f32) + attn_bias  # [BS, PACK]

        # Per-head softmax with NO lane-splitting reshape:
        #  * a global row max is a valid per-row-constant stability shift
        #    (exact softmax; masked keys carry -1e9 so their exp is 0),
        #  * e @ bd_mask broadcasts each head's denominator across that head's
        #    HEAD_DIM output columns, so normalization follows the PV matmul.
        e = jnp.exp(scores - jnp.max(scores, axis=-1, keepdims=True))     # [BS, PACK]
        denom = jnp.dot(e, bd_mask, preferred_element_type=f32)           # [BS, H]
        ctx = (jnp.dot(e.astype(bf16), v_bd, preferred_element_type=f32)
               * pl.reciprocal(denom, approx=True))                       # [BS, H]

        attn = (jnp.dot(ctx.astype(bf16), wo_ref[l],
                        preferred_element_type=f32) + vecs[0:1, :])
        h1 = _layernorm(x + attn, vecs[1:2, :], vecs[2:3, :])
        ff = _gelu(jnp.dot(h1.astype(bf16), w1_ref[l],
                           preferred_element_type=f32) + bi1_ref[l])
        ff = (jnp.dot(ff.astype(bf16), w2_ref[l],
                      preferred_element_type=f32) + vecs[3:4, :])
        x = _layernorm(h1 + ff, vecs[4:5, :], vecs[5:6, :])

    # ---- discriminator head ----
    hstate = _gelu(jnp.dot(x.astype(bf16), wd_ref[...],
                           preferred_element_type=f32) + bd_ref[...])   # [BS, H]
    hidden_ref[...] = hstate.astype(hidden_ref.dtype)                   # flat [BS, H]

    # dense_prediction (out_features=1) as wp @ hstate^T -> a lane row (1, BS);
    # f32 matmul keeps full precision and avoids a [BS,1] -> row relayout.
    logits = lax.dot_general(wp_ref[...], hstate, _BT,
                             preferred_element_type=f32) + bp_ref[...]  # [1, BS]
    logits_ref[...] = logits.astype(logits_ref.dtype)

    labels = (ids_ref[...] != fake_ref[...]).astype(f32)                # [1, BS]
    sel = (mask_ref[...] != 0.0).astype(f32)                            # attended positions
    # stable BCE-with-logits: max(x,0) - x*y + log(1 + exp(-|x|))
    bce = (jnp.maximum(logits, 0.0) - logits * labels
           + jnp.log(1.0 + jnp.exp(-jnp.abs(logits))))
    denom_l = jnp.maximum(jnp.sum(sel), 1.0)       # guard against all-padded masks
    # TODO(synk): an SMEM scalar output would shave one tiny padded VMEM store;
    # kept as a (1,1) VMEM block for guaranteed lowering of the vector-derived scalar.
    loss_ref[...] = jnp.full((1, 1), jnp.sum(bce * sel) / denom_l, dtype=f32)


# ---------------- parameters (deterministic synthetic init, packed layout) ----------------
def init_params(key):
    keys = iter(jax.random.split(key, 32))

    def w(shape):
        return jax.random.normal(next(keys), shape, jnp.float32) * 0.02

    scale = 1.0 / math.sqrt(HEAD_DIM)

    params = {
        "word_emb": w((VOCAB, HIDDEN)),
        "pos_emb": w((MAX_POS, HIDDEN)),
        "type_emb": w((2, HIDDEN)),
        "emb_ln": jnp.stack([jnp.ones(HIDDEN, jnp.float32),
                             jnp.zeros(HIDDEN, jnp.float32)]),          # [2, H] gamma;beta
        "head_wd": w((HIDDEN, HIDDEN)).astype(jnp.bfloat16),            # [H, H]
        "head_bd": jnp.zeros((1, HIDDEN), jnp.float32),
        "head_wp": w((1, HIDDEN)),                                      # dense_prediction row
        "head_bp": jnp.zeros((1, 1), jnp.float32),
    }

    ones_h = jnp.ones(HIDDEN, jnp.float32)
    zeros_h = jnp.zeros(HIDDEN, jnp.float32)
    wqkv, bqkv, wo, w1, bi1, w2, vecs = [], [], [], [], [], [], []
    for _ in range(N_LAYERS):
        wq, wk, wv = w((HIDDEN, HIDDEN)), w((HIDDEN, HIDDEN)), w((HIDDEN, HIDDEN))
        # Fold the 1/sqrt(head_dim) attention scale into the Q projection
        # (parameter-time fold: zero runtime cost, removes a per-layer VPU mul).
        wqkv.append(jnp.concatenate([wq * scale, wk, wv], axis=1))      # fused Q|K|V
        bqkv.append(jnp.zeros((1, 3 * HIDDEN), jnp.float32))            # (Q-bias fold is a no-op on zeros)
        wo.append(w((HIDDEN, HIDDEN)))
        w1.append(w((HIDDEN, INTER)))
        bi1.append(jnp.zeros((1, INTER), jnp.float32))
        w2.append(w((INTER, HIDDEN)))
        # packed H-sized vectors: bo, ln1_gamma, ln1_beta, bi2, ln2_gamma, ln2_beta
        vecs.append(jnp.stack([zeros_h, ones_h, zeros_h,
                               zeros_h, ones_h, zeros_h]))
    params["wqkv"] = jnp.stack(wqkv).astype(jnp.bfloat16)   # [L, H, 3H]
    params["bqkv"] = jnp.stack(bqkv)                        # [L, 1, 3H]
    params["wo"] = jnp.stack(wo).astype(jnp.bfloat16)       # [L, H, H]
    params["w1"] = jnp.stack(w1).astype(jnp.bfloat16)       # [L, H, INTER]
    params["bi1"] = jnp.stack(bi1)                          # [L, 1, INTER]
    params["w2"] = jnp.stack(w2).astype(jnp.bfloat16)       # [L, INTER, H]
    params["vecs"] = jnp.stack(vecs)                        # [L, 6, H]
    return params


# ---------------- full model forward ----------------
def electra_discriminator(params, input_ids, fake_input_ids, attention_mask):
    mask_f = attention_mask.astype(jnp.float32)

    # Glue (fused by XLA with the gather): word + position + token-type embeds,
    # pre-flattened to the lane-friendly [BS, H] slab the kernel consumes directly.
    # Backbone runs on the *fake* input ids, as in the PyTorch module; token_type id 0.
    emb = (jnp.take(params["word_emb"], fake_input_ids, axis=0)
           + params["pos_emb"][:S][None, :, :]
           + params["type_emb"][0][None, None, :]).reshape(BS, HIDDEN)   # [BS, H]

    # Block-diagonal (per-batch) + key-padding additive attention bias over the
    # flattened token axis, tiled across the packed head axis -> [BS, N_HEADS*BS].
    tok_batch = jnp.arange(BS, dtype=jnp.int32) // S
    same_batch = tok_batch[:, None] == tok_batch[None, :]
    key_ok = mask_f.reshape(BS)[None, :] > 0.0
    attn_bias = jnp.where(same_batch & key_ok, 0.0, -1e9).astype(jnp.float32)   # [BS, BS]
    bias_packed = jnp.tile(attn_bias, (1, N_HEADS))                             # [BS, PACK]

    # Block-diagonal head selector: row h*BS+j keeps only head h's HEAD_DIM columns.
    head_of_row = jnp.arange(PACK, dtype=jnp.int32) // BS
    head_of_col = jnp.arange(HIDDEN, dtype=jnp.int32) // HEAD_DIM
    bd_mask = (head_of_row[:, None] == head_of_col[None, :]).astype(jnp.float32)  # [PACK, H]

    logits_row, hidden_flat, loss = pl.pallas_call(
        fused_electra_kernel,
        out_shape=(
            jax.ShapeDtypeStruct((1, BS), jnp.float32),          # logits (single lane row)
            jax.ShapeDtypeStruct((BS, HIDDEN), jnp.float32),     # hidden_state (flat)
            jax.ShapeDtypeStruct((1, 1), jnp.float32),           # loss
        ),
    )(emb, bias_packed, bd_mask,
      mask_f.reshape(1, BS), input_ids.reshape(1, BS), fake_input_ids.reshape(1, BS),
      params["emb_ln"],
      params["wqkv"], params["bqkv"], params["wo"], params["w1"],
      params["bi1"], params["w2"], params["vecs"],
      params["head_wd"], params["head_bd"], params["head_wp"], params["head_bp"])

    # DiscriminatorOutput(logits, hidden_state, loss) — reshapes happen in XLA land.
    return (logits_row.reshape(B, S),
            hidden_flat.reshape(B, S, HIDDEN),
            loss[0, 0])


if __name__ == "__main__":
    key = jax.random.PRNGKey(0)
    kp, k1, k2, k3 = jax.random.split(key, 4)
    params = init_params(kp)

    input_ids = jax.random.randint(k1, (B, S), 0, VOCAB, dtype=jnp.int32)
    flip = jax.random.bernoulli(k2, 0.3, (B, S))
    replacement = jax.random.randint(k3, (B, S), 0, VOCAB, dtype=jnp.int32)
    fake_input_ids = jnp.where(flip, replacement, input_ids)
    attention_mask = jnp.concatenate(
        [jnp.ones((B, S - 4), jnp.int32), jnp.zeros((B, 4), jnp.int32)], axis=1)

    logits, hidden_state, loss = electra_discriminator(
        params, input_ids, fake_input_ids, attention_mask)
    jax.block_until_ready((logits, hidden_state, loss))

    assert logits.shape == (B, S)
    assert hidden_state.shape == (B, S, HIDDEN)
    assert loss.shape == ()
    assert bool(jnp.isfinite(loss))
    print("KERNEL_OK")
</pallas_src>

<mosaic_0001>
module attributes {stable_mosaic.version = 11 : i64} {
  func.func @fused_electra_kernel(%arg0: memref<32x64xf32, #tpu.memory_space<vmem>>, %arg1: memref<32x128xf32, #tpu.memory_space<vmem>>, %arg2: memref<128x64xf32, #tpu.memory_space<vmem>>, %arg3: memref<1x32xf32, #tpu.memory_space<vmem>>, %arg4: memref<1x32xi32, #tpu.memory_space<vmem>>, %arg5: memref<1x32xi32, #tpu.memory_space<vmem>>, %arg6: memref<2x64xf32, #tpu.memory_space<vmem>>, %arg7: memref<2x64x192xbf16, #tpu.memory_space<vmem>>, %arg8: memref<2x1x192xf32, #tpu.memory_space<vmem>>, %arg9: memref<2x64x64xbf16, #tpu.memory_space<vmem>>, %arg10: memref<2x64x128xbf16, #tpu.memory_space<vmem>>, %arg11: memref<2x1x128xf32, #tpu.memory_space<vmem>>, %arg12: memref<2x128x64xbf16, #tpu.memory_space<vmem>>, %arg13: memref<2x6x64xf32, #tpu.memory_space<vmem>>, %arg14: memref<64x64xbf16, #tpu.memory_space<vmem>>, %arg15: memref<1x64xf32, #tpu.memory_space<vmem>>, %arg16: memref<1x64xf32, #tpu.memory_space<vmem>>, %arg17: memref<1x1xf32, #tpu.memory_space<vmem>>, %arg18: memref<1x32xf32, #tpu.memory_space<vmem>>, %arg19: memref<32x64xf32, #tpu.memory_space<vmem>>, %arg20: memref<1x1xf32, #tpu.memory_space<vmem>>) attributes {dimension_semantics = [], scalar_prefetch = 0 : i64, scratch_operands = 0 : i64, tpu.core_type = #tpu.core_type<tc>} {
    %c0 = arith.constant 0 : index
    %c0_0 = arith.constant 0 : index
    %0 = vector.load %arg0[%c0, %c0_0] : memref<32x64xf32, #tpu.memory_space<vmem>>, vector<32x64xf32>
    %c0_1 = arith.constant 0 : index
    %c0_2 = arith.constant 0 : index
    %1 = vector.load %arg6[%c0_1, %c0_2] : memref<2x64xf32, #tpu.memory_space<vmem>>, vector<1x64xf32>
    %c1 = arith.constant 1 : index
    %c0_3 = arith.constant 0 : index
    %2 = vector.load %arg6[%c1, %c0_3] : memref<2x64xf32, #tpu.memory_space<vmem>>, vector<1x64xf32>
    %cst = arith.constant dense<0.000000e+00> : vector<32xf32>
    %3 = vector.multi_reduction <add>, %0, %cst [1] : vector<32x64xf32> to vector<32xf32>
    %4 = vector.shape_cast %3 : vector<32xf32> to vector<32x1xf32>
    %cst_4 = arith.constant 6.400000e+01 : f32
    %5 = vector.broadcast %cst_4 : f32 to vector<32x1xf32>
    %6 = arith.divf %4, %5 : vector<32x1xf32>
    %7 = vector.broadcast %6 : vector<32x1xf32> to vector<32x64xf32>
    %8 = arith.subf %0, %7 : vector<32x64xf32>
    %9 = arith.mulf %8, %8 : vector<32x64xf32>
    %cst_5 = arith.constant dense<0.000000e+00> : vector<32xf32>
    %10 = vector.multi_reduction <add>, %9, %cst_5 [1] : vector<32x64xf32> to vector<32xf32>
    %11 = vector.shape_cast %10 : vector<32xf32> to vector<32x1xf32>
    %cst_6 = arith.constant 6.400000e+01 : f32
    %12 = vector.broadcast %cst_6 : f32 to vector<32x1xf32>
    %13 = arith.divf %11, %12 : vector<32x1xf32>
    %14 = vector.broadcast %6 : vector<32x1xf32> to vector<32x64xf32>
    %15 = arith.subf %0, %14 : vector<32x64xf32>
    %cst_7 = arith.constant 9.99999996E-13 : f32
    %16 = vector.broadcast %cst_7 : f32 to vector<32x1xf32>
    %17 = arith.addf %13, %16 : vector<32x1xf32>
    %18 = math.rsqrt %17 : vector<32x1xf32>
    %19 = vector.broadcast %18 : vector<32x1xf32> to vector<32x64xf32>
    %20 = arith.mulf %15, %19 : vector<32x64xf32>
    %21 = vector.broadcast %1 : vector<1x64xf32> to vector<32x64xf32>
    %22 = arith.mulf %20, %21 : vector<32x64xf32>
    %23 = vector.broadcast %2 : vector<1x64xf32> to vector<32x64xf32>
    %24 = arith.addf %22, %23 : vector<32x64xf32>
    %c0_8 = arith.constant 0 : index
    %c0_9 = arith.constant 0 : index
    %25 = vector.load %arg1[%c0_8, %c0_9] : memref<32x128xf32, #tpu.memory_space<vmem>>, vector<32x128xf32>
    %c0_10 = arith.constant 0 : index
    %c0_11 = arith.constant 0 : index
    %26 = vector.load %arg2[%c0_10, %c0_11] : memref<128x64xf32, #tpu.memory_space<vmem>>, vector<128x64xf32>
    %c0_12 = arith.constant 0 : index
    %c0_13 = arith.constant 0 : index
    %c0_14 = arith.constant 0 : index
    %27 = vector.load %arg13[%c0_12, %c0_13, %c0_14] : memref<2x6x64xf32, #tpu.memory_space<vmem>>, vector<1x6x64xf32>
    %28 = vector.shape_cast %27 : vector<1x6x64xf32> to vector<6x64xf32>
    %29 = arith.truncf %24 : vector<32x64xf32> to vector<32x64xbf16>
    %c0_15 = arith.constant 0 : index
    %c0_16 = arith.constant 0 : index
    %c0_17 = arith.constant 0 : index
    %30 = vector.load %arg7[%c0_15, %c0_16, %c0_17] : memref<2x64x192xbf16, #tpu.memory_space<vmem>>, vector<1x64x192xbf16>
    %31 = vector.shape_cast %30 : vector<1x64x192xbf16> to vector<64x192xbf16>
    %cst_18 = arith.constant dense<0.000000e+00> : vector<32x192xf32>
    %32 = tpu.matmul %29, %31, %cst_18 {dimension_numbers = #tpu.dot_dimension_numbers<[1], [0], [0], [1], [0, 0, 1, 1], [], []>} : vector<32x64xbf16>, vector<64x192xbf16>, vector<32x192xf32> -> vector<32x192xf32>
    %c0_19 = arith.constant 0 : index
    %c0_20 = arith.constant 0 : index
    %c0_21 = arith.constant 0 : index
    %33 = vector.load %arg8[%c0_19, %c0_20, %c0_21] : memref<2x1x192xf32, #tpu.memory_space<vmem>>, vector<1x1x192xf32>
    %34 = vector.shape_cast %33 : vector<1x1x192xf32> to vector<1x192xf32>
    %35 = vector.broadcast %34 : vector<1x192xf32> to vector<32x192xf32>
    %36 = arith.addf %32, %35 : vector<32x192xf32>
    %37 = vector.extract_strided_slice %36 {offsets = [0, 0], sizes = [32, 64], strides = [1, 1]} : vector<32x192xf32> to vector<32x64xf32>
    %38 = arith.truncf %37 : vector<32x64xf32> to vector<32x64xbf16>
    %39 = vector.extract_strided_slice %36 {offsets = [0, 64], sizes = [32, 64], strides = [1, 1]} : vector<32x192xf32> to vector<32x64xf32>
    %40 = tpu.concatenate %39, %39, %39, %39 in 0 : vector<32x64xf32>, vector<32x64xf32>, vector<32x64xf32>, vector<32x64xf32> -> vector<128x64xf32>
    %41 = arith.mulf %40, %26 : vector<128x64xf32>
    %42 = arith.truncf %41 : vector<128x64xf32> to vector<128x64xbf16>
    %43 = vector.extract_strided_slice %36 {offsets = [0, 128], sizes = [32, 64], strides = [1, 1]} : vector<32x192xf32> to vector<32x64xf32>
    %44 = tpu.concatenate %43, %43, %43, %43 in 0 : vector<32x64xf32>, vector<32x64xf32>, vector<32x64xf32>, vector<32x64xf32> -> vector<128x64xf32>
    %45 = arith.mulf %44, %26 : vector<128x64xf32>
    %46 = arith.truncf %45 : vector<128x64xf32> to vector<128x64xbf16>
    %cst_22 = arith.constant dense<0.000000e+00> : vector<32x128xf32>
    %47 = tpu.matmul %38, %42, %cst_22 {dimension_numbers = #tpu.dot_dimension_numbers<[1], [1], [0], [0], [0, 0, 1, 0], [], []>} : vector<32x64xbf16>, vector<128x64xbf16>, vector<32x128xf32> -> vector<32x128xf32>
    %48 = arith.addf %47, %25 : vector<32x128xf32>
    %cst_23 = arith.constant dense<0xFF800000> : vector<32xf32>
    %49 = vector.multi_reduction <maximumf>, %48, %cst_23 [1] : vector<32x128xf32> to vector<32xf32>
    %50 = vector.shape_cast %49 : vector<32xf32> to vector<32x1xf32>
    %51 = vector.broadcast %50 : vector<32x1xf32> to vector<32x128xf32>
    %52 = arith.subf %48, %51 : vector<32x128xf32>
    %53 = math.exp %52 : vector<32x128xf32>
    %cst_24 = arith.constant dense<0.000000e+00> : vector<32x64xf32>
    %54 = tpu.matmul %53, %26, %cst_24 {dimension_numbers = #tpu.dot_dimension_numbers<[1], [0], [0], [1], [0, 0, 1, 1], [], []>} : vector<32x128xf32>, vector<128x64xf32>, vector<32x64xf32> -> vector<32x64xf32>
    %55 = arith.truncf %53 : vector<32x128xf32> to vector<32x128xbf16>
    %cst_25 = arith.constant dense<0.000000e+00> : vector<32x64xf32>
    %56 = tpu.matmul %55, %46, %cst_25 {dimension_numbers = #tpu.dot_dimension_numbers<[1], [0], [0], [1], [0, 0, 1, 1], [], []>} : vector<32x128xbf16>, vector<128x64xbf16>, vector<32x64xf32> -> vector<32x64xf32>
    %57 = tpu.reciprocal %54 {approx = true} : vector<32x64xf32> -> vector<32x64xf32>
    %58 = arith.mulf %56, %57 : vector<32x64xf32>
    %59 = arith.truncf %58 : vector<32x64xf32> to vector<32x64xbf16>
    %c0_26 = arith.constant 0 : index
    %c0_27 = arith.constant 0 : index
    %c0_28 = arith.constant 0 : index
    %60 = vector.load %arg9[%c0_26, %c0_27, %c0_28] : memref<2x64x64xbf16, #tpu.memory_space<vmem>>, vector<1x64x64xbf16>
    %61 = vector.shape_cast %60 : vector<1x64x64xbf16> to vector<64x64xbf16>
    %cst_29 = arith.constant dense<0.000000e+00> : vector<32x64xf32>
    %62 = tpu.matmul %59, %61, %cst_29 {dimension_numbers = #tpu.dot_dimension_numbers<[1], [0], [0], [1], [0, 0, 1, 1], [], []>} : vector<32x64xbf16>, vector<64x64xbf16>, vector<32x64xf32> -> vector<32x64xf32>
    %63 = vector.extract_strided_slice %28 {offsets = [0, 0], sizes = [1, 64], strides = [1, 1]} : vector<6x64xf32> to vector<1x64xf32>
    %64 = vector.broadcast %63 : vector<1x64xf32> to vector<32x64xf32>
    %65 = arith.addf %62, %64 : vector<32x64xf32>
    %66 = arith.addf %24, %65 : vector<32x64xf32>
    %67 = vector.extract_strided_slice %28 {offsets = [1, 0], sizes = [1, 64], strides = [1, 1]} : vector<6x64xf32> to vector<1x64xf32>
    %68 = vector.extract_strided_slice %28 {offsets = [2, 0], sizes = [1, 64], strides = [1, 1]} : vector<6x64xf32> to vector<1x64xf32>
    %cst_30 = arith.constant dense<0.000000e+00> : vector<32xf32>
    %69 = vector.multi_reduction <add>, %66, %cst_30 [1] : vector<32x64xf32> to vector<32xf32>
    %70 = vector.shape_cast %69 : vector<32xf32> to vector<32x1xf32>
    %cst_31 = arith.constant 6.400000e+01 : f32
    %71 = vector.broadcast %cst_31 : f32 to vector<32x1xf32>
    %72 = arith.divf %70, %71 : vector<32x1xf32>
    %73 = vector.broadcast %72 : vector<32x1xf32> to vector<32x64xf32>
    %74 = arith.subf %66, %73 : vector<32x64xf32>
    %75 = arith.mulf %74, %74 : vector<32x64xf32>
    %cst_32 = arith.constant dense<0.000000e+00> : vector<32xf32>
    %76 = vector.multi_reduction <add>, %75, %cst_32 [1] : vector<32x64xf32> to vector<32xf32>
    %77 = vector.shape_cast %76 : vector<32xf32> to vector<32x1xf32>
    %cst_33 = arith.constant 6.400000e+01 : f32
    %78 = vector.broadcast %cst_33 : f32 to vector<32x1xf32>
    %79 = arith.divf %77, %78 : vector<32x1xf32>
    %80 = vector.broadcast %72 : vector<32x1xf32> to vector<32x64xf32>
    %81 = arith.subf %66, %80 : vector<32x64xf32>
    %cst_34 = arith.constant 9.99999996E-13 : f32
    %82 = vector.broadcast %cst_34 : f32 to vector<32x1xf32>
    %83 = arith.addf %79, %82 : vector<32x1xf32>
    %84 = math.rsqrt %83 : vector<32x1xf32>
    %85 = vector.broadcast %84 : vector<32x1xf32> to vector<32x64xf32>
    %86 = arith.mulf %81, %85 : vector<32x64xf32>
    %87 = vector.broadcast %67 : vector<1x64xf32> to vector<32x64xf32>
    %88 = arith.mulf %86, %87 : vector<32x64xf32>
    %89 = vector.broadcast %68 : vector<1x64xf32> to vector<32x64xf32>
    %90 = arith.addf %88, %89 : vector<32x64xf32>
    %91 = arith.truncf %90 : vector<32x64xf32> to vector<32x64xbf16>
    %c0_35 = arith.constant 0 : index
    %c0_36 = arith.constant 0 : index
    %c0_37 = arith.constant 0 : index
    %92 = vector.load %arg10[%c0_35, %c0_36, %c0_37] : memref<2x64x128xbf16, #tpu.memory_space<vmem>>, vector<1x64x128xbf16>
    %93 = vector.shape_cast %92 : vector<1x64x128xbf16> to vector<64x128xbf16>
    %cst_38 = arith.constant dense<0.000000e+00> : vector<32x128xf32>
    %94 = tpu.matmul %91, %93, %cst_38 {dimension_numbers = #tpu.dot_dimension_numbers<[1], [0], [0], [1], [0, 0, 1, 1], [], []>} : vector<32x64xbf16>, vector<64x128xbf16>, vector<32x128xf32> -> vector<32x128xf32>
    %c0_39 = arith.constant 0 : index
    %c0_40 = arith.constant 0 : index
    %c0_41 = arith.constant 0 : index
    %95 = vector.load %arg11[%c0_39, %c0_40, %c0_41] : memref<2x1x128xf32, #tpu.memory_space<vmem>>, vector<1x1x128xf32>
    %96 = vector.shape_cast %95 : vector<1x1x128xf32> to vector<1x128xf32>
    %97 = vector.broadcast %96 : vector<1x128xf32> to vector<32x128xf32>
    %98 = arith.addf %94, %97 : vector<32x128xf32>
    %99 = arith.mulf %98, %98 : vector<32x128xf32>
    %100 = arith.mulf %98, %99 : vector<32x128xf32>
    %cst_42 = arith.constant 4.471500e-02 : f32
    %101 = vector.broadcast %cst_42 : f32 to vector<32x128xf32>
    %102 = arith.mulf %101, %100 : vector<32x128xf32>
    %103 = arith.addf %98, %102 : vector<32x128xf32>
    %cst_43 = arith.constant 0.797884583 : f32
    %104 = vector.broadcast %cst_43 : f32 to vector<32x128xf32>
    %105 = arith.mulf %104, %103 : vector<32x128xf32>
    %106 = math.tanh %105 : vector<32x128xf32>
    %cst_44 = arith.constant 1.000000e+00 : f32
    %107 = vector.broadcast %cst_44 : f32 to vector<32x128xf32>
    %108 = arith.addf %107, %106 : vector<32x128xf32>
    %cst_45 = arith.constant 5.000000e-01 : f32
    %109 = vector.broadcast %cst_45 : f32 to vector<32x128xf32>
    %110 = arith.mulf %109, %108 : vector<32x128xf32>
    %111 = arith.mulf %98, %110 : vector<32x128xf32>
    %112 = arith.truncf %111 : vector<32x128xf32> to vector<32x128xbf16>
    %c0_46 = arith.constant 0 : index
    %c0_47 = arith.constant 0 : index
    %c0_48 = arith.constant 0 : index
    %113 = vector.load %arg12[%c0_46, %c0_47, %c0_48] : memref<2x128x64xbf16, #tpu.memory_space<vmem>>, vector<1x128x64xbf16>
    %114 = vector.shape_cast %113 : vector<1x128x64xbf16> to vector<128x64xbf16>
    %cst_49 = arith.constant dense<0.000000e+00> : vector<32x64xf32>
    %115 = tpu.matmul %112, %114, %cst_49 {dimension_numbers = #tpu.dot_dimension_numbers<[1], [0], [0], [1], [0, 0, 1, 1], [], []>} : vector<32x128xbf16>, vector<128x64xbf16>, vector<32x64xf32> -> vector<32x64xf32>
    %116 = vector.extract_strided_slice %28 {offsets = [3, 0], sizes = [1, 64], strides = [1, 1]} : vector<6x64xf32> to vector<1x64xf32>
    %117 = vector.broadcast %116 : vector<1x64xf32> to vector<32x64xf32>
    %118 = arith.addf %115, %117 : vector<32x64xf32>
    %119 = arith.addf %90, %118 : vector<32x64xf32>
    %120 = vector.extract_strided_slice %28 {offsets = [4, 0], sizes = [1, 64], strides = [1, 1]} : vector<6x64xf32> to vector<1x64xf32>
    %121 = vector.extract_strided_slice %28 {offsets = [5, 0], sizes = [1, 64], strides = [1, 1]} : vector<6x64xf32> to vector<1x64xf32>
    %cst_50 = arith.constant dense<0.000000e+00> : vector<32xf32>
    %122 = vector.multi_reduction <add>, %119, %cst_50 [1] : vector<32x64xf32> to vector<32xf32>
    %123 = vector.shape_cast %122 : vector<32xf32> to vector<32x1xf32>
    %cst_51 = arith.constant 6.400000e+01 : f32
    %124 = vector.broadcast %cst_51 : f32 to vector<32x1xf32>
    %125 = arith.divf %123, %124 : vector<32x1xf32>
    %126 = vector.broadcast %125 : vector<32x1xf32> to vector<32x64xf32>
    %127 = arith.subf %119, %126 : vector<32x64xf32>
    %128 = arith.mulf %127, %127 : vector<32x64xf32>
    %cst_52 = arith.constant dense<0.000000e+00> : vector<32xf32>
    %129 = vector.multi_reduction <add>, %128, %cst_52 [1] : vector<32x64xf32> to vector<32xf32>
    %130 = vector.shape_cast %129 : vector<32xf32> to vector<32x1xf32>
    %cst_53 = arith.constant 6.400000e+01 : f32
    %131 = vector.broadcast %cst_53 : f32 to vector<32x1xf32>
    %132 = arith.divf %130, %131 : vector<32x1xf32>
    %133 = vector.broadcast %125 : vector<32x1xf32> to vector<32x64xf32>
    %134 = arith.subf %119, %133 : vector<32x64xf32>
    %cst_54 = arith.constant 9.99999996E-13 : f32
    %135 = vector.broadcast %cst_54 : f32 to vector<32x1xf32>
    %136 = arith.addf %132, %135 : vector<32x1xf32>
    %137 = math.rsqrt %136 : vector<32x1xf32>
    %138 = vector.broadcast %137 : vector<32x1xf32> to vector<32x64xf32>
    %139 = arith.mulf %134, %138 : vector<32x64xf32>
    %140 = vector.broadcast %120 : vector<1x64xf32> to vector<32x64xf32>
    %141 = arith.mulf %139, %140 : vector<32x64xf32>
    %142 = vector.broadcast %121 : vector<1x64xf32> to vector<32x64xf32>
    %143 = arith.addf %141, %142 : vector<32x64xf32>
    %c1_55 = arith.constant 1 : index
    %c0_56 = arith.constant 0 : index
    %c0_57 = arith.constant 0 : index
    %144 = vector.load %arg13[%c1_55, %c0_56, %c0_57] : memref<2x6x64xf32, #tpu.memory_space<vmem>>, vector<1x6x64xf32>
    %145 = vector.shape_cast %144 : vector<1x6x64xf32> to vector<6x64xf32>
    %146 = arith.truncf %143 : vector<32x64xf32> to vector<32x64xbf16>
    %c1_58 = arith.constant 1 : index
    %c0_59 = arith.constant 0 : index
    %c0_60 = arith.constant 0 : index
    %147 = vector.load %arg7[%c1_58, %c0_59, %c0_60] : memref<2x64x192xbf16, #tpu.memory_space<vmem>>, vector<1x64x192xbf16>
    %148 = vector.shape_cast %147 : vector<1x64x192xbf16> to vector<64x192xbf16>
    %cst_61 = arith.constant dense<0.000000e+00> : vector<32x192xf32>
    %149 = tpu.matmul %146, %148, %cst_61 {dimension_numbers = #tpu.dot_dimension_numbers<[1], [0], [0], [1], [0, 0, 1, 1], [], []>} : vector<32x64xbf16>, vector<64x192xbf16>, vector<32x192xf32> -> vector<32x192xf32>
    %c1_62 = arith.constant 1 : index
    %c0_63 = arith.constant 0 : index
    %c0_64 = arith.constant 0 : index
    %150 = vector.load %arg8[%c1_62, %c0_63, %c0_64] : memref<2x1x192xf32, #tpu.memory_space<vmem>>, vector<1x1x192xf32>
    %151 = vector.shape_cast %150 : vector<1x1x192xf32> to vector<1x192xf32>
    %152 = vector.broadcast %151 : vector<1x192xf32> to vector<32x192xf32>
    %153 = arith.addf %149, %152 : vector<32x192xf32>
    %154 = vector.extract_strided_slice %153 {offsets = [0, 0], sizes = [32, 64], strides = [1, 1]} : vector<32x192xf32> to vector<32x64xf32>
    %155 = arith.truncf %154 : vector<32x64xf32> to vector<32x64xbf16>
    %156 = vector.extract_strided_slice %153 {offsets = [0, 64], sizes = [32, 64], strides = [1, 1]} : vector<32x192xf32> to vector<32x64xf32>
    %157 = tpu.concatenate %156, %156, %156, %156 in 0 : vector<32x64xf32>, vector<32x64xf32>, vector<32x64xf32>, vector<32x64xf32> -> vector<128x64xf32>
    %158 = arith.mulf %157, %26 : vector<128x64xf32>
    %159 = arith.truncf %158 : vector<128x64xf32> to vector<128x64xbf16>
    %160 = vector.extract_strided_slice %153 {offsets = [0, 128], sizes = [32, 64], strides = [1, 1]} : vector<32x192xf32> to vector<32x64xf32>
    %161 = tpu.concatenate %160, %160, %160, %160 in 0 : vector<32x64xf32>, vector<32x64xf32>, vector<32x64xf32>, vector<32x64xf32> -> vector<128x64xf32>
    %162 = arith.mulf %161, %26 : vector<128x64xf32>
    %163 = arith.truncf %162 : vector<128x64xf32> to vector<128x64xbf16>
    %cst_65 = arith.constant dense<0.000000e+00> : vector<32x128xf32>
    %164 = tpu.matmul %155, %159, %cst_65 {dimension_numbers = #tpu.dot_dimension_numbers<[1], [1], [0], [0], [0, 0, 1, 0], [], []>} : vector<32x64xbf16>, vector<128x64xbf16>, vector<32x128xf32> -> vector<32x128xf32>
    %165 = arith.addf %164, %25 : vector<32x128xf32>
    %cst_66 = arith.constant dense<0xFF800000> : vector<32xf32>
    %166 = vector.multi_reduction <maximumf>, %165, %cst_66 [1] : vector<32x128xf32> to vector<32xf32>
    %167 = vector.shape_cast %166 : vector<32xf32> to vector<32x1xf32>
    %168 = vector.broadcast %167 : vector<32x1xf32> to vector<32x128xf32>
    %169 = arith.subf %165, %168 : vector<32x128xf32>
    %170 = math.exp %169 : vector<32x128xf32>
    %cst_67 = arith.constant dense<0.000000e+00> : vector<32x64xf32>
    %171 = tpu.matmul %170, %26, %cst_67 {dimension_numbers = #tpu.dot_dimension_numbers<[1], [0], [0], [1], [0, 0, 1, 1], [], []>} : vector<32x128xf32>, vector<128x64xf32>, vector<32x64xf32> -> vector<32x64xf32>
    %172 = arith.truncf %170 : vector<32x128xf32> to vector<32x128xbf16>
    %cst_68 = arith.constant dense<0.000000e+00> : vector<32x64xf32>
    %173 = tpu.matmul %172, %163, %cst_68 {dimension_numbers = #tpu.dot_dimension_numbers<[1], [0], [0], [1], [0, 0, 1, 1], [], []>} : vector<32x128xbf16>, vector<128x64xbf16>, vector<32x64xf32> -> vector<32x64xf32>
    %174 = tpu.reciprocal %171 {approx = true} : vector<32x64xf32> -> vector<32x64xf32>
    %175 = arith.mulf %173, %174 : vector<32x64xf32>
    %176 = arith.truncf %175 : vector<32x64xf32> to vector<32x64xbf16>
    %c1_69 = arith.constant 1 : index
    %c0_70 = arith.constant 0 : index
    %c0_71 = arith.constant 0 : index
    %177 = vector.load %arg9[%c1_69, %c0_70, %c0_71] : memref<2x64x64xbf16, #tpu.memory_space<vmem>>, vector<1x64x64xbf16>
    %178 = vector.shape_cast %177 : vector<1x64x64xbf16> to vector<64x64xbf16>
    %cst_72 = arith.constant dense<0.000000e+00> : vector<32x64xf32>
    %179 = tpu.matmul %176, %178, %cst_72 {dimension_numbers = #tpu.dot_dimension_numbers<[1], [0], [0], [1], [0, 0, 1, 1], [], []>} : vector<32x64xbf16>, vector<64x64xbf16>, vector<32x64xf32> -> vector<32x64xf32>
    %180 = vector.extract_strided_slice %145 {offsets = [0, 0], sizes = [1, 64], strides = [1, 1]} : vector<6x64xf32> to vector<1x64xf32>
    %181 = vector.broadcast %180 : vector<1x64xf32> to vector<32x64xf32>
    %182 = arith.addf %179, %181 : vector<32x64xf32>
    %183 = arith.addf %143, %182 : vector<32x64xf32>
    %184 = vector.extract_strided_slice %145 {offsets = [1, 0], sizes = [1, 64], strides = [1, 1]} : vector<6x64xf32> to vector<1x64xf32>
    %185 = vector.extract_strided_slice %145 {offsets = [2, 0], sizes = [1, 64], strides = [1, 1]} : vector<6x64xf32> to vector<1x64xf32>
    %cst_73 = arith.constant dense<0.000000e+00> : vector<32xf32>
    %186 = vector.multi_reduction <add>, %183, %cst_73 [1] : vector<32x64xf32> to vector<32xf32>
    %187 = vector.shape_cast %186 : vector<32xf32> to vector<32x1xf32>
    %cst_74 = arith.constant 6.400000e+01 : f32
    %188 = vector.broadcast %cst_74 : f32 to vector<32x1xf32>
    %189 = arith.divf %187, %188 : vector<32x1xf32>
    %190 = vector.broadcast %189 : vector<32x1xf32> to vector<32x64xf32>
    %191 = arith.subf %183, %190 : vector<32x64xf32>
    %192 = arith.mulf %191, %191 : vector<32x64xf32>
    %cst_75 = arith.constant dense<0.000000e+00> : vector<32xf32>
    %193 = vector.multi_reduction <add>, %192, %cst_75 [1] : vector<32x64xf32> to vector<32xf32>
    %194 = vector.shape_cast %193 : vector<32xf32> to vector<32x1xf32>
    %cst_76 = arith.constant 6.400000e+01 : f32
    %195 = vector.broadcast %cst_76 : f32 to vector<32x1xf32>
    %196 = arith.divf %194, %195 : vector<32x1xf32>
    %197 = vector.broadcast %189 : vector<32x1xf32> to vector<32x64xf32>
    %198 = arith.subf %183, %197 : vector<32x64xf32>
    %cst_77 = arith.constant 9.99999996E-13 : f32
    %199 = vector.broadcast %cst_77 : f32 to vector<32x1xf32>
    %200 = arith.addf %196, %199 : vector<32x1xf32>
    %201 = math.rsqrt %200 : vector<32x1xf32>
    %202 = vector.broadcast %201 : vector<32x1xf32> to vector<32x64xf32>
    %203 = arith.mulf %198, %202 : vector<32x64xf32>
    %204 = vector.broadcast %184 : vector<1x64xf32> to vector<32x64xf32>
    %205 = arith.mulf %203, %204 : vector<32x64xf32>
    %206 = vector.broadcast %185 : vector<1x64xf32> to vector<32x64xf32>
    %207 = arith.addf %205, %206 : vector<32x64xf32>
    %208 = arith.truncf %207 : vector<32x64xf32> to vector<32x64xbf16>
    %c1_78 = arith.constant 1 : index
    %c0_79 = arith.constant 0 : index
    %c0_80 = arith.constant 0 : index
    %209 = vector.load %arg10[%c1_78, %c0_79, %c0_80] : memref<2x64x128xbf16, #tpu.memory_space<vmem>>, vector<1x64x128xbf16>
    %210 = vector.shape_cast %209 : vector<1x64x128xbf16> to vector<64x128xbf16>
    %cst_81 = arith.constant dense<0.000000e+00> : vector<32x128xf32>
    %211 = tpu.matmul %208, %210, %cst_81 {dimension_numbers = #tpu.dot_dimension_numbers<[1], [0], [0], [1], [0, 0, 1, 1], [], []>} : vector<32x64xbf16>, vector<64x128xbf16>, vector<32x128xf32> -> vector<32x128xf32>
    %c1_82 = arith.constant 1 : index
    %c0_83 = arith.constant 0 : index
    %c0_84 = arith.constant 0 : index
    %212 = vector.load %arg11[%c1_82, %c0_83, %c0_84] : memref<2x1x128xf32, #tpu.memory_space<vmem>>, vector<1x1x128xf32>
    %213 = vector.shape_cast %212 : vector<1x1x128xf32> to vector<1x128xf32>
    %214 = vector.broadcast %213 : vector<1x128xf32> to vector<32x128xf32>
    %215 = arith.addf %211, %214 : vector<32x128xf32>
    %216 = arith.mulf %215, %215 : vector<32x128xf32>
    %217 = arith.mulf %215, %216 : vector<32x128xf32>
    %cst_85 = arith.constant 4.471500e-02 : f32
    %218 = vector.broadcast %cst_85 : f32 to vector<32x128xf32>
    %219 = arith.mulf %218, %217 : vector<32x128xf32>
    %220 = arith.addf %215, %219 : vector<32x128xf32>
    %cst_86 = arith.constant 0.797884583 : f32
    %221 = vector.broadcast %cst_86 : f32 to vector<32x128xf32>
    %222 = arith.mulf %221, %220 : vector<32x128xf32>
    %223 = math.tanh %222 : vector<32x128xf32>
    %cst_87 = arith.constant 1.000000e+00 : f32
    %224 = vector.broadcast %cst_87 : f32 to vector<32x128xf32>
    %225 = arith.addf %224, %223 : vector<32x128xf32>
    %cst_88 = arith.constant 5.000000e-01 : f32
    %226 = vector.broadcast %cst_88 : f32 to vector<32x128xf32>
    %227 = arith.mulf %226, %225 : vector<32x128xf32>
    %228 = arith.mulf %215, %227 : vector<32x128xf32>
    %229 = arith.truncf %228 : vector<32x128xf32> to vector<32x128xbf16>
    %c1_89 = arith.constant 1 : index
    %c0_90 = arith.constant 0 : index
    %c0_91 = arith.constant 0 : index
    %230 = vector.load %arg12[%c1_89, %c0_90, %c0_91] : memref<2x128x64xbf16, #tpu.memory_space<vmem>>, vector<1x128x64xbf16>
    %231 = vector.shape_cast %230 : vector<1x128x64xbf16> to vector<128x64xbf16>
    %cst_92 = arith.constant dense<0.000000e+00> : vector<32x64xf32>
    %232 = tpu.matmul %229, %231, %cst_92 {dimension_numbers = #tpu.dot_dimension_numbers<[1], [0], [0], [1], [0, 0, 1, 1], [], []>} : vector<32x128xbf16>, vector<128x64xbf16>, vector<32x64xf32> -> vector<32x64xf32>
    %233 = vector.extract_strided_slice %145 {offsets = [3, 0], sizes = [1, 64], strides = [1, 1]} : vector<6x64xf32> to vector<1x64xf32>
    %234 = vector.broadcast %233 : vector<1x64xf32> to vector<32x64xf32>
    %235 = arith.addf %232, %234 : vector<32x64xf32>
    %236 = arith.addf %207, %235 : vector<32x64xf32>
    %237 = vector.extract_strided_slice %145 {offsets = [4, 0], sizes = [1, 64], strides = [1, 1]} : vector<6x64xf32> to vector<1x64xf32>
    %238 = vector.extract_strided_slice %145 {offsets = [5, 0], sizes = [1, 64], strides = [1, 1]} : vector<6x64xf32> to vector<1x64xf32>
    %cst_93 = arith.constant dense<0.000000e+00> : vector<32xf32>
    %239 = vector.multi_reduction <add>, %236, %cst_93 [1] : vector<32x64xf32> to vector<32xf32>
    %240 = vector.shape_cast %239 : vector<32xf32> to vector<32x1xf32>
    %cst_94 = arith.constant 6.400000e+01 : f32
    %241 = vector.broadcast %cst_94 : f32 to vector<32x1xf32>
    %242 = arith.divf %240, %241 : vector<32x1xf32>
    %243 = vector.broadcast %242 : vector<32x1xf32> to vector<32x64xf32>
    %244 = arith.subf %236, %243 : vector<32x64xf32>
    %245 = arith.mulf %244, %244 : vector<32x64xf32>
    %cst_95 = arith.constant dense<0.000000e+00> : vector<32xf32>
    %246 = vector.multi_reduction <add>, %245, %cst_95 [1] : vector<32x64xf32> to vector<32xf32>
    %247 = vector.shape_cast %246 : vector<32xf32> to vector<32x1xf32>
    %cst_96 = arith.constant 6.400000e+01 : f32
    %248 = vector.broadcast %cst_96 : f32 to vector<32x1xf32>
    %249 = arith.divf %247, %248 : vector<32x1xf32>
    %250 = vector.broadcast %242 : vector<32x1xf32> to vector<32x64xf32>
    %251 = arith.subf %236, %250 : vector<32x64xf32>
    %cst_97 = arith.constant 9.99999996E-13 : f32
    %252 = vector.broadcast %cst_97 : f32 to vector<32x1xf32>
    %253 = arith.addf %249, %252 : vector<32x1xf32>
    %254 = math.rsqrt %253 : vector<32x1xf32>
    %255 = vector.broadcast %254 : vector<32x1xf32> to vector<32x64xf32>
    %256 = arith.mulf %251, %255 : vector<32x64xf32>
    %257 = vector.broadcast %237 : vector<1x64xf32> to vector<32x64xf32>
    %258 = arith.mulf %256, %257 : vector<32x64xf32>
    %259 = vector.broadcast %238 : vector<1x64xf32> to vector<32x64xf32>
    %260 = arith.addf %258, %259 : vector<32x64xf32>
    %261 = arith.truncf %260 : vector<32x64xf32> to vector<32x64xbf16>
    %c0_98 = arith.constant 0 : index
    %c0_99 = arith.constant 0 : index
    %262 = vector.load %arg14[%c0_98, %c0_99] : memref<64x64xbf16, #tpu.memory_space<vmem>>, vector<64x64xbf16>
    %cst_100 = arith.constant dense<0.000000e+00> : vector<32x64xf32>
    %263 = tpu.matmul %261, %262, %cst_100 {dimension_numbers = #tpu.dot_dimension_numbers<[1], [0], [0], [1], [0, 0, 1, 1], [], []>} : vector<32x64xbf16>, vector<64x64xbf16>, vector<32x64xf32> -> vector<32x64xf32>
    %c0_101 = arith.constant 0 : index
    %c0_102 = arith.constant 0 : index
    %264 = vector.load %arg15[%c0_101, %c0_102] : memref<1x64xf32, #tpu.memory_space<vmem>>, vector<1x64xf32>
    %265 = vector.broadcast %264 : vector<1x64xf32> to vector<32x64xf32>
    %266 = arith.addf %263, %265 : vector<32x64xf32>
    %267 = arith.mulf %266, %266 : vector<32x64xf32>
    %268 = arith.mulf %266, %267 : vector<32x64xf32>
    %cst_103 = arith.constant 4.471500e-02 : f32
    %269 = vector.broadcast %cst_103 : f32 to vector<32x64xf32>
    %270 = arith.mulf %269, %268 : vector<32x64xf32>
    %271 = arith.addf %266, %270 : vector<32x64xf32>
    %cst_104 = arith.constant 0.797884583 : f32
    %272 = vector.broadcast %cst_104 : f32 to vector<32x64xf32>
    %273 = arith.mulf %272, %271 : vector<32x64xf32>
    %274 = math.tanh %273 : vector<32x64xf32>
    %cst_105 = arith.constant 1.000000e+00 : f32
    %275 = vector.broadcast %cst_105 : f32 to vector<32x64xf32>
    %276 = arith.addf %275, %274 : vector<32x64xf32>
    %cst_106 = arith.constant 5.000000e-01 : f32
    %277 = vector.broadcast %cst_106 : f32 to vector<32x64xf32>
    %278 = arith.mulf %277, %276 : vector<32x64xf32>
    %279 = arith.mulf %266, %278 : vector<32x64xf32>
    %c0_107 = arith.constant 0 : index
    %c0_108 = arith.constant 0 : index
    %280 = vector.load %arg19[%c0_107, %c0_108] : memref<32x64xf32, #tpu.memory_space<vmem>>, vector<32x64xf32>
    tpu.vector_store %arg19[%c0_107, %c0_108], %279 {strides = array<i32>} : memref<32x64xf32, #tpu.memory_space<vmem>>, vector<32x64xf32>,
    %c0_109 = arith.constant 0 : index
    %c0_110 = arith.constant 0 : index
    %281 = vector.load %arg16[%c0_109, %c0_110] : memref<1x64xf32, #tpu.memory_space<vmem>>, vector<1x64xf32>
    %cst_111 = arith.constant dense<0.000000e+00> : vector<1x32xf32>
    %282 = tpu.matmul %281, %279, %cst_111 {dimension_numbers = #tpu.dot_dimension_numbers<[1], [1], [0], [0], [0, 0, 1, 0], [], []>} : vector<1x64xf32>, vector<32x64xf32>, vector<1x32xf32> -> vector<1x32xf32>
    %c0_112 = arith.constant 0 : index
    %c0_113 = arith.constant 0 : index
    %283 = vector.load %arg17[%c0_112, %c0_113] : memref<1x1xf32, #tpu.memory_space<vmem>>, vector<1x1xf32>
    %284 = vector.broadcast %283 : vector<1x1xf32> to vector<1x32xf32>
    %285 = arith.addf %282, %284 : vector<1x32xf32>
    %c0_114 = arith.constant 0 : index
    %c0_115 = arith.constant 0 : index
    %286 = vector.load %arg18[%c0_114, %c0_115] : memref<1x32xf32, #tpu.memory_space<vmem>>, vector<1x32xf32>
    tpu.vector_store %arg18[%c0_114, %c0_115], %285 {strides = array<i32>} : memref<1x32xf32, #tpu.memory_space<vmem>>, vector<1x32xf32>,
    %c0_116 = arith.constant 0 : index
    %c0_117 = arith.constant 0 : index
    %287 = vector.load %arg4[%c0_116, %c0_117] : memref<1x32xi32, #tpu.memory_space<vmem>>, vector<1x32xi32>
    %c0_118 = arith.constant 0 : index
    %c0_119 = arith.constant 0 : index
    %288 = vector.load %arg5[%c0_118, %c0_119] : memref<1x32xi32, #tpu.memory_space<vmem>>, vector<1x32xi32>
    %289 = arith.cmpi ne, %287, %288 : vector<1x32xi32>
    %290 = arith.extui %289 : vector<1x32xi1> to vector<1x32xi32>
    %291 = arith.sitofp %290 : vector<1x32xi32> to vector<1x32xf32>
    %c0_120 = arith.constant 0 : index
    %c0_121 = arith.constant 0 : index
    %292 = vector.load %arg3[%c0_120, %c0_121] : memref<1x32xf32, #tpu.memory_space<vmem>>, vector<1x32xf32>
    %cst_122 = arith.constant 0.000000e+00 : f32
    %293 = vector.broadcast %cst_122 : f32 to vector<1x32xf32>
    %294 = arith.cmpf one, %292, %293 : vector<1x32xf32>
    %295 = arith.extui %294 : vector<1x32xi1> to vector<1x32xi32>
    %296 = arith.sitofp %295 : vector<1x32xi32> to vector<1x32xf32>
    %cst_123 = arith.constant 0.000000e+00 : f32
    %297 = vector.broadcast %cst_123 : f32 to vector<1x32xf32>
    %298 = arith.maximumf %285, %297 : vector<1x32xf32>
    %299 = arith.mulf %285, %291 : vector<1x32xf32>
    %300 = arith.subf %298, %299 : vector<1x32xf32>
    %301 = math.absf %285 : vector<1x32xf32>
    %cst_124 = arith.constant 0.000000e+00 : f32
    %302 = vector.broadcast %cst_124 : f32 to vector<1x32xf32>
    %303 = arith.subf %302, %301 : vector<1x32xf32>
    %304 = math.exp %303 : vector<1x32xf32>
    %cst_125 = arith.constant 1.000000e+00 : f32
    %305 = vector.broadcast %cst_125 : f32 to vector<1x32xf32>
    %306 = arith.addf %305, %304 : vector<1x32xf32>
    %307 = math.log %306 : vector<1x32xf32>
    %308 = arith.addf %300, %307 : vector<1x32xf32>
    %309 = vector.shape_cast %296 : vector<1x32xf32> to vector<1x1x32xf32>
    %cst_126 = arith.constant dense<0.000000e+00> : vector<1xf32>
    %310 = vector.multi_reduction <add>, %309, %cst_126 [1, 2] : vector<1x1x32xf32> to vector<1xf32>
    %311 = vector.shape_cast %310 : vector<1xf32> to vector<1x1x1xf32>
    %312 = vector.extract %311[0, 0, 0] : f32 from vector<1x1x1xf32>
    %cst_127 = arith.constant 1.000000e+00 : f32
    %313 = arith.maximumf %312, %cst_127 : f32
    %314 = arith.mulf %308, %296 : vector<1x32xf32>
    %315 = vector.shape_cast %314 : vector<1x32xf32> to vector<1x1x32xf32>
    %cst_128 = arith.constant dense<0.000000e+00> : vector<1xf32>
    %316 = vector.multi_reduction <add>, %315, %cst_128 [1, 2] : vector<1x1x32xf32> to vector<1xf32>
    %317 = vector.shape_cast %316 : vector<1xf32> to vector<1x1x1xf32>
    %318 = vector.extract %317[0, 0, 0] : f32 from vector<1x1x1xf32>
    %319 = arith.divf %318, %313 : f32
    %320 = vector.broadcast %319 : f32 to vector<1x1xf32>
    %c0_129 = arith.constant 0 : index
    %c0_130 = arith.constant 0 : index
    %321 = vector.load %arg20[%c0_129, %c0_130] : memref<1x1xf32, #tpu.memory_space<vmem>>, vector<1x1xf32>
    tpu.vector_store %arg20[%c0_129, %c0_130], %320 {strides = array<i32>} : memref<1x1xf32, #tpu.memory_space<vmem>>, vector<1x1xf32>,
    return
  }
}

</mosaic_0001>

<bundles_post_ra>
// kernel: tpu_custom_call.1
= control target key start
LH: loop header
LB: loop body
LE: loop exit
PB: predicated region body
PF: predicated region fallthrough
CT: control target
= control target key end

     0   :  { %s3721_s0 = inlined_call_operand.vmem [shape: f32[32,64], index: 0, kind: input, shape index: {}]   ;;  %s3722_s1 = inlined_call_operand.vmem [shape: f32[32,128], index: 1, kind: input, shape index: {}]   ;;  %s3723_s2 = inlined_call_operand.vmem [shape: f32[128,64], index: 2, kind: input, shape index: {}]   ;;  %s3724_s3 = inlined_call_operand.vmem [shape: f32[1,32], index: 3, kind: input, shape index: {}]   ;;  %s3725_s4 = inlined_call_operand.vmem [shape: s32[1,32], index: 4, kind: input, shape index: {}]   ;;  %s3726_s5 = inlined_call_operand.vmem [shape: s32[1,32], index: 5, kind: input, shape index: {}]   ;;  %s3727_s6 = inlined_call_operand.vmem [shape: f32[2,64], index: 6, kind: input, shape index: {}]   ;;  %s3728_s7 = inlined_call_operand.vmem [shape: bf16[2,64,192], index: 7, kind: input, shape index: {}]   ;;  %s3729_s8 = inlined_call_operand.vmem [shape: f32[2,1,192], index: 8, kind: input, shape index: {}]   ;;  %s3730_s9 = inlined_call_operand.vmem [shape: bf16[2,64,64], index: 9, kind: input, shape index: {}]   ;;  %s3731_s10 = inlined_call_operand.vmem [shape: bf16[2,64,128], index: 10, kind: input, shape index: {}]   ;;  %s3732_s11 = inlined_call_operand.vmem [shape: f32[2,1,128], index: 11, kind: input, shape index: {}]   ;;  %s3733_s12 = inlined_call_operand.vmem [shape: bf16[2,128,64], index: 12, kind: input, shape index: {}]   ;;  %s3734_s13 = inlined_call_operand.vmem [shape: f32[2,6,64], index: 13, kind: input, shape index: {}]   ;;  %s3735_s14 = inlined_call_operand.hbm [shape: bf16[64,64], index: 14, kind: input, shape index: {}]   ;;  %s3736_s15 = inlined_call_operand.vmem [shape: f32[1,64], index: 15, kind: input, shape index: {}]   ;;  %s3737_s16 = inlined_call_operand.vmem [shape: f32[1,64], index: 16, kind: input, shape index: {}]   ;;  %s3738_s17 = inlined_call_operand.<no memory space> [shape: f32[1,1], index: 17, kind: input, shape index: {}]   ;;  %s3739_s18 = inlined_call_operand.hbm [shape: f32[1,32], index: 18, kind: output, shape index: {0}]   ;;  %s3740_s19 = inlined_call_operand.hbm [shape: f32[32,64], index: 19, kind: output, shape index: {1}]   ;;  %s3741_s20 = inlined_call_operand.hbm [shape: f32[1,1], index: 20, kind: output, shape index: {2}]  }
   0x1   :  { %3745 = sst [smem:[#allocation13_spill]] %s3721_s0  ;;  %v26_v0 = vstv %s3738_s17 }
   0x2   :  { %3746 = sst [smem:[#allocation14_spill]] %s3722_s1  ;;  %27 = vst [vmem:[#allocation2] sm:$0x1] %v26_v0 }
   0x3   :  { %3747 = sst [smem:[#allocation15_spill]] %s3723_s2 }
   0x4   :  { %3748 = sst [smem:[#allocation16_spill]] %s3724_s3 }
   0x5   :  { %3749 = sst [smem:[#allocation17_spill]] %s3725_s4 }
   0x6   :  { %28 = vsyncpa [#allocation4], 0 }
   0x7   :  { %29 = vsyncpa [#allocation5], 0 }
   0x8   :  { %30 = vsyncpa [#allocation8], 0  ;;  %s63_s2 = sshll.u32 %s3735_s14, 4  ;;  %s2634_s25 = smov [#allocation3]   ;;  %s64_s2 = int_to_ptr.hbm [resolvable:$true] %s63_s2 }
   0x9   :  { %s65_s3 = sshll.u32 %s2634_s25, 4  ;;  %s2635_s26 = smov 64   ;;  %s66_s3 = int_to_ptr.vmem [resolvable:$true] %s65_s3 }
   0xa   :  { %s2636_s27 = smov 4  }
   0xb   :  { %71 = dma.hbm_to_vmem [thread:$0]  %s64_s2, 512, %s66_s3, [#allocation4], %s2635_s26, %s2635_s26, %s2636_s27  }
   0xc   :  { %2628 = dma.done.wait [#allocation4], 512  }
   0xd   :  { %2629 = vsyncadd [#allocation4], 4294966784  ;;  %vm89_vm0 = vcmask 523264   ;;  %s3750_s4 = sld [smem:[#allocation13_spill]]  ;;  %v2637_v9 = vmov 64.0   ;;  %s2642_s23 = smov 8  }
   0xe   :  { %2408 = vrcp.f32 %v2637_v9  ;;  %s3751_s24 = sld [smem:[#allocation15_spill]]  ;;  %v2074_v38 = vld [vmem:[%s3728_s7 + $0x30] sm:$0xf]  ;;  %v2335_v39 = vld [vmem:[%s3728_s7 + $0x34] sm:$0xf0]  ;;  %s2005_s3 = sshll.u32 %s3739_s18, 4  ;;  %s2006_s3 = int_to_ptr.hbm [resolvable:$true] %s2005_s3 }
   0xf   :  { %v2334_v40 = vld [vmem:[%s3728_s7 + $0x34] sm:$0xf]  ;;  %v2075_v41 = vor.u32 %v2335_v39, %v2074_v38  ;;  %v2076_v42 = vld [vmem:[%s3728_s7 + $0x38] sm:$0xf0]  ;;  %v2066_v44 = vld [vmem:[%s3728_s7 + $0x20] sm:$0xf] }
  0x10   :  { %v2079_v43 = vor.u32 %v2334_v40, %v2076_v42  ;;  %v2333_v45 = vld [vmem:[%s3728_s7 + $0x24] sm:$0xf0]  ;;  %v2332_v46 = vld [vmem:[%s3728_s7 + $0x24] sm:$0xf]  ;;  %v2068_v48 = vld [vmem:[%s3728_s7 + $0x28] sm:$0xf0] }
  0x11   :  { %282 = vmatpush.bf16.msra.mxu0 %v2075_v41  ;;  %v2067_v47 = vor.u32 %v2333_v45, %v2066_v44  ;;  %v2071_v49 = vor.u32 %v2332_v46, %v2068_v48  ;;  %v2058_v51 = vld [vmem:[%s3728_s7 + $0x10] sm:$0xf]  ;;  %v2331_v52 = vld [vmem:[%s3728_s7 + $0x14] sm:$0xf0]  ;;  %v2330_v53 = vld [vmem:[%s3728_s7 + $0x14] sm:$0xf] }
  0x12   :  { %301 = vmatpush.bf16.msra.mxu1 %v2079_v43  ;;  %v2059_v54 = vor.u32 %v2331_v52, %v2058_v51  ;;  %v2060_v55 = vld [vmem:[%s3728_s7 + $0x18] sm:$0xf0]  ;;  %v2050_v58 = vld [vmem:[%s3728_s7] sm:$0xf]  ;;  %v2329_v59 = vld [vmem:[%s3728_s7 + $0x4] sm:$0xf0] }
  0x13   :  { %v85_v1 = vld [vmem:[%s3750_s4 + $0x10] sm:$0xff]  ;;  %v83_v2 = vld [vmem:[%s3750_s4] sm:$0xff]  ;;  %v86_v5 = vld [vmem:[%s3750_s4 + $0x18] sm:$0xff]  ;;  %v2063_v57 = vor.u32 %v2330_v53, %v2060_v55  ;;  %v2051_v63 = vor.u32 %v2329_v59, %v2050_v58  ;;  %s3752_s14 = sld [smem:[#allocation14_spill]]  ;;  %s2643_s27 = smov [#allocation6]  }
  0x14   :  { %v96_v3 = vsel %vm89_vm0, %v85_v1, 0.0  ;;  %v90_v4 = vsel %vm89_vm0, %v83_v2, 0.0  ;;  %v84_v6 = vld [vmem:[%s3750_s4 + $0x8] sm:$0xff]  ;;  %v99_v7 = vsel %vm89_vm0, %v86_v5, 0.0  ;;  %v2409_v10 = vpop.eup %2408  ;;  %v2804_v36 = vld [vmem:[%s3751_s24 + $0x78] sm:$0xff]  ;;  %v2812_v37 = vld [vmem:[%s3751_s24 + $0x50] sm:$0xff] }
  0x15   :  { %97 = vadd.xlane.f32.xlu1 %v96_v3  ;;  %91 = vadd.xlane.f32.xlu0 %v90_v4  ;;  %v93_v8 = vsel %vm89_vm0, %v84_v6, 0.0  ;;  %v103_v11 = vmul.f32 64.0, %v2409_v10  ;;  %vm107_vm1 = vweird.f32 %v2409_v10  ;;  %v2843_v50 = vld [vmem:[%s3751_s24 + $0x48] sm:$0xff]  ;;  %v2328_v60 = vld [vmem:[%s3728_s7 + $0x4] sm:$0xf]  ;;  %v2956_v40 = vld [vmem:[%s3751_s24 + $0x30] sm:$0xff] }
  0x16   :  { %523 = vmatpush.msra.mxu3 %v2804_v36  ;;  %283 = vmatpush.bf16.msra.mxu0 %v2067_v47  ;;  %v2052_v0 = vld [vmem:[%s3728_s7 + $0x8] sm:$0xf0]  ;;  %v2880_v3 = vld [vmem:[%s3751_s24 + $0x20] sm:$0xff]  ;;  %v2961_v41 = vld [vmem:[%s3751_s24 + $0x38] sm:$0xff]  ;;  %s2645_s18 = smov [#allocation9]  }
  0x17   :  { %v104_v12 = vsub.f32 1.0, %v103_v11  ;;  %302 = vmatpush.bf16.msra.mxu1 %v2071_v49  ;;  %v2893_v9 = vld [vmem:[%s3751_s24 + $0x60] sm:$0xff]  ;;  %v2977_v49 = vld [vmem:[%s3751_s24 + $0x28] sm:$0xff] }
  0x18   :  { %v2403_v48 = vld [vmem:[%s3727_s6] ss:$0 sm:$0xff] }
  0x19   :  { %v105_v13 = vmul.f32 %v2409_v10, %v104_v12 }
  0x1a   :  { %284 = vmatpush.bf16.msra.mxu0 %v2059_v54 }
  0x1b   :  { %v106_v14 = vadd.f32 %v2409_v10, %v105_v13  ;;  %303 = vmatpush.bf16.msra.mxu1 %v2063_v57  ;;  %v2908_v13 = vld [vmem:[%s3751_s24 + $0x10] sm:$0xff]  ;;  %v2988_v57 = vld [vmem:[%s3751_s24 + $0x18] sm:$0xff] }
  0x1d   :  { %100 = vadd.xlane.f32.xlu1 %v99_v7  ;;  %94 = vadd.xlane.f32.xlu0 %v93_v8  ;;  %v2775_v15 = vsel %vm107_vm1, %v2409_v10, %v106_v14  ;;  %v2898_v10 = vld [vmem:[%s3751_s24 + $0x68] sm:$0xff] }
  0x1e   :  { %285 = vmatpush.bf16.msra.mxu0 %v2051_v63 }
  0x88   :  { %v98_v16 = vpop.xlane.xlu1 %97  ;;  %v92_v17 = vpop.xlane.xlu0 %91 }
  0x89   :  { %v111_v18 = vmul.f32 %v2775_v15, %v98_v16  ;;  %v109_v19 = vmul.f32 %v2775_v15, %v92_v17 }
  0x8b   :  { %v2779_v20 = vsub.f32 %v85_v1, %v111_v18  ;;  %v2781_v21 = vsub.f32 %v83_v2, %v109_v19  ;;  %v2875_v1 = vld [vmem:[%s3751_s24 + $0x70] sm:$0xff]  ;;  %v2055_v2 = vor.u32 %v2328_v60, %v2052_v0  ;;  %v2919_v19 = vld [vmem:[%s3751_s24 + $0x58] sm:$0xff] }
  0x8c   :  { %524 = vmatpush.msra.mxu3 %v2875_v1 }
  0x8d   :  { %v119_v22 = vmul.f32 %v2779_v20, %v2779_v20  ;;  %v117_v23 = vmul.f32 %v2781_v21, %v2781_v21  ;;  %304 = vmatpush.bf16.msra.mxu1 %v2055_v2 }
  0x8e   :  { %525 = vmatpush.msra.mxu3 %v2898_v10 }
  0x8f   :  { %v127_v24 = vsel %vm89_vm0, %v119_v22, 0.0  ;;  %v121_v25 = vsel %vm89_vm0, %v117_v23, 0.0  ;;  %v2928_v23 = vld [vmem:[%s3751_s24 + $0x40] sm:$0xff] }
  0x90   :  { %v101_v26 = vpop.xlane.xlu1 %100  ;;  %128 = vadd.xlane.f32.xlu0 %v127_v24  ;;  %122 = vadd.xlane.f32.xlu2 %v121_v25  ;;  %v95_v27 = vpop.xlane.xlu0 %94 }
  0x91   :  { %v112_v28 = vmul.f32 %v2775_v15, %v101_v26  ;;  %v110_v29 = vmul.f32 %v2775_v15, %v95_v27  ;;  %526 = vmatpush.msra.mxu3 %v2893_v9  ;;  %v2939_v27 = vld [vmem:[%s3751_s24] sm:$0xff] }
  0x93   :  { %v2791_v30 = vsub.f32 %v86_v5, %v112_v28  ;;  %v2793_v31 = vsub.f32 %v84_v6, %v110_v29  ;;  %527 = vmatpush.msra.mxu3 %v2919_v19 }
  0x95   :  { %v120_v32 = vmul.f32 %v2791_v30, %v2791_v30  ;;  %v118_v33 = vmul.f32 %v2793_v31, %v2793_v31  ;;  %528 = vmatpush.msra.mxu3 %v2812_v37 }
  0x97   :  { %v130_v34 = vsel %vm89_vm0, %v120_v32, 0.0  ;;  %v124_v35 = vsel %vm89_vm0, %v118_v33, 0.0  ;;  %529 = vmatpush.msra.mxu3 %v2843_v50 }
  0x98   :  { %131 = vadd.xlane.f32.xlu1 %v130_v34  ;;  %125 = vadd.xlane.f32.xlu2 %v124_v35 }
  0x99   :  { %530 = vmatpush.msra.mxu3 %v2928_v23 }
  0x9b   :  { %531 = vmatpush.msra.mxu3 %v2961_v41 }
  0x9d   :  { %532 = vmatpush.msra.mxu3 %v2956_v40 }
  0x9f   :  { %533 = vmatpush.msra.mxu3 %v2977_v49 }
  0xa1   :  { %534 = vmatpush.msra.mxu3 %v2880_v3 }
  0xa3   :  { %535 = vmatpush.msra.mxu3 %v2988_v57 }
  0xa4   :  { %364 = vrot.lane.b32.xlu0 %v2804_v36, %s2635_s26 }
  0xa5   :  { %536 = vmatpush.msra.mxu3 %v2908_v13 }
  0xac   :  { %354 = vrot.lane.b32.xlu0 %v2812_v37, %s2635_s26 }
  0xb0   :  { %362 = vrot.lane.b32.xlu2 %v2875_v1, %s2635_s26 }
  0xb1   :  { %358 = vrot.lane.b32.xlu1 %v2893_v9, %s2635_s26 }
  0xb4   :  { %352 = vrot.lane.b32.xlu0 %v2843_v50, %s2635_s26 }
  0xb8   :  { %360 = vrot.lane.b32.xlu2 %v2898_v10, %s2635_s26 }
  0xb9   :  { %350 = vrot.lane.b32.xlu1 %v2928_v23, %s2635_s26 }
  0xbc   :  { %342 = vrot.lane.b32.xlu0 %v2880_v3, %s2635_s26 }
  0xc0   :  { %356 = vrot.lane.b32.xlu2 %v2919_v19, %s2635_s26 }
  0xc1   :  { %348 = vrot.lane.b32.xlu1 %v2961_v41, %s2635_s26 }
  0xc4   :  { %338 = vrot.lane.b32.xlu0 %v2908_v13, %s2635_s26 }
  0xc8   :  { %346 = vrot.lane.b32.xlu2 %v2956_v40, %s2635_s26 }
  0xcc   :  { %334 = vrot.lane.b32.xlu0 %v2939_v27, %s2635_s26 }
  0xd0   :  { %344 = vrot.lane.b32.xlu2 %v2977_v49, %s2635_s26 }
  0xd8   :  { %340 = vrot.lane.b32.xlu2 %v2988_v57, %s2635_s26 }
 0x103   :  { %v123_v56 = vpop.xlane.xlu2 %122  ;;  %v129_v62 = vpop.xlane.xlu0 %128 }
 0x104   :  { %v133_v61 = vmul.f32 %v123_v56, %v2775_v15  ;;  %v135_v5 = vmul.f32 %v129_v62, %v2775_v15  ;;  %v2404_v56 = vld [vmem:[%s3727_s6 + $0x1] ss:$0 sm:$0xff]  ;;  %v3006_v62 = vld [vmem:[%s3751_s24 + $0x8] sm:$0xff] }
 0x105   :  { %537 = vmatpush.msra.mxu3 %v3006_v62  ;;  %336 = vrot.lane.b32.xlu2 %v3006_v62, %s2635_s26 }
 0x106   :  { %v137_v4 = vadd.f32 1e-12, %v133_v61  ;;  %v2888_v6 = vadd.f32 1e-12, %v135_v5 }
 0x107   :  { %538 = vmatpush.msra.mxu3 %v2939_v27 }
 0x108   :  { %2410 = vrsqrt.f32 %v137_v4  ;;  %vm147_vm3 = vweird.f32 %v137_v4  ;;  %vm167_vm10 = vweird.f32 %v2888_v6 }
 0x109   :  { %2412 = vrsqrt.f32 %v2888_v6 }
 0x10b   :  { %v132_v7 = vpop.xlane.xlu1 %131  ;;  %v126_v8 = vpop.xlane.xlu2 %125 }
 0x10c   :  { %v136_v11 = vmul.f32 %v132_v7, %v2775_v15  ;;  %v134_v12 = vmul.f32 %v126_v8, %v2775_v15 }
 0x10e   :  { %v2411_v14 = vpop.eup %2410  ;;  %v2912_v16 = vadd.f32 1e-12, %v136_v11  ;;  %v138_v17 = vadd.f32 1e-12, %v134_v12 }
 0x10f   :  { %v142_v18 = vmul.f32 %v2411_v14, %v137_v4  ;;  %v2934_v25 = vpop.eup %2412  ;;  %vm148_vm2 = vweird.f32 %v2411_v14 }
 0x110   :  { %2414 = vrsqrt.f32 %v2912_v16  ;;  %v162_v34 = vmul.f32 %v2934_v25, %v2888_v6  ;;  %vm149_vm4 = vmor %vm147_vm3, %vm148_vm2  ;;  %vm157_vm6 = vweird.f32 %v138_v17  ;;  %vm177_vm8 = vweird.f32 %v2912_v16 }
 0x111   :  { %v143_v22 = vmul.f32 %v2411_v14, %v142_v18  ;;  %2416 = vrsqrt.f32 %v138_v17  ;;  %vm168_vm11 = vweird.f32 %v2934_v25 }
 0x112   :  { %v163_v43 = vmul.f32 %v2934_v25, %v162_v34  ;;  %vm169_vm13 = vmor %vm167_vm10, %vm168_vm11 }
 0x113   :  { %v144_v24 = vmul.f32 0.5, %v143_v22 }
 0x114   :  { %v164_v51 = vmul.f32 0.5, %v163_v43 }
 0x115   :  { %v145_v26 = vsub.f32 1.5, %v144_v24 }
 0x116   :  { %v2943_v28 = vpop.eup %2414  ;;  %v165_v58 = vsub.f32 1.5, %v164_v51 }
 0x117   :  { %v2417_v29 = vpop.eup %2416  ;;  %v172_v32 = vmul.f32 %v2943_v28, %v2912_v16  ;;  %v146_v33 = vmul.f32 %v2411_v14, %v145_v26  ;;  %vm178_vm9 = vweird.f32 %v2943_v28 }
 0x118   :  { %v152_v35 = vmul.f32 %v2417_v29, %v138_v17  ;;  %vm158_vm5 = vweird.f32 %v2417_v29  ;;  %vm179_vm12 = vmor %vm177_vm8, %vm178_vm9  ;;  %v166_v63 = vmul.f32 %v2934_v25, %v165_v58 }
 0x119   :  { %v173_v38 = vmul.f32 %v2943_v28, %v172_v32  ;;  %v150_v42 = vsel %vm149_vm4, %v2411_v14, %v146_v33  ;;  %vm159_vm7 = vmor %vm157_vm6, %vm158_vm5 }
 0x11a   :  { %v153_v39 = vmul.f32 %v2417_v29, %v152_v35  ;;  %v181_v47 = vmul.f32 %v150_v42, %v2781_v21  ;;  %v170_v4 = vsel %vm169_vm13, %v2934_v25, %v166_v63  ;;  %v226_v25 = vld [vmem:[%s3729_s8] sm:$0x3] }
 0x11b   :  { %v174_v45 = vmul.f32 0.5, %v173_v38  ;;  %v183_v6 = vmul.f32 %v170_v4, %v2779_v20  ;;  %v3035_v20 = vpop.permute.xlu0 %364  ;;  %v228_v32 = vperm.slane %v226_v25, 0 }
 0x11c   :  { %v154_v44 = vmul.f32 0.5, %v153_v39  ;;  %v186_v55 = vmul.f32 %v2403_v48, %v181_v47 }
 0x11d   :  { %v175_v53 = vsub.f32 1.5, %v174_v45  ;;  %v188_v8 = vmul.f32 %v2403_v48, %v183_v6 }
 0x11e   :  { %v155_v46 = vsub.f32 1.5, %v154_v44  ;;  %v2999_v60 = vadd.f32 %v2404_v56, %v186_v55 }
 0x11f   :  { %v3025_v12 = vadd.f32 %v2404_v56, %v188_v8 }
 0x120   :  { %v156_v52 = vmul.f32 %v2417_v29, %v155_v46 }
 0x122   :  { %v160_v54 = vsel %vm159_vm7, %v2417_v29, %v156_v52  ;;  %v229_v52 = vperm.slane %v226_v25, 1 }
 0x123   :  { %v182_v21 = vmul.f32 %v160_v54, %v2793_v31  ;;  %v176_v31 = vmul.f32 %v2943_v28, %v175_v53  ;;  %v3039_v18 = vpop.permute.xlu0 %354  ;;  %v3041_v22 = vpop.permute.xlu1 %358 }
 0x125   :  { %v187_v59 = vmul.f32 %v2403_v48, %v182_v21  ;;  %v180_v2 = vsel %vm179_vm12, %v2943_v28, %v176_v31 }
 0x126   :  { %v184_v5 = vmul.f32 %v180_v2, %v2791_v30  ;;  %v3031_v30 = vpop.permute.xlu2 %362 }
 0x127   :  { %v3001_v61 = vadd.f32 %v2404_v56, %v187_v59 }
 0x128   :  { %v189_v7 = vmul.f32 %v2403_v48, %v184_v5 }
 0x129   :  { %v216_v0 = vpack.c.bf16 %v3001_v61, %v2999_v60 }
 0x12a   :  { %v3021_v11 = vadd.f32 %v2404_v56, %v189_v7 }
 0x12b   :  { %2080 = vmatmul.msk.bf16.vlgmr.msra.gmra.mxu0 %vm89_vm0, %v216_v0  ;;  %2082 = vmatmul.msk.bf16.vlgmr.msra.gmra.mxu1 %vm89_vm0, %v216_v0  ;;  %v3048_v29 = vpop.permute.xlu0 %352  ;;  %v3052_v34 = vpop.permute.xlu1 %350 }
 0x12c   :  { %v217_v14 = vpack.c.bf16 %v3021_v11, %v3025_v12 }
 0x12e   :  { %v3033_v16 = vpop.permute.xlu2 %360 }
 0x133   :  { %v3062_v45 = vpop.permute.xlu0 %342  ;;  %v3073_v56 = vpop.permute.xlu1 %348 }
 0x136   :  { %v3037_v17 = vpop.permute.xlu2 %356 }
 0x13b   :  { %2081 = vmatmul.msk.bf16.gmra.mxu0 %vm89_vm0, %v217_v14  ;;  %2083 = vmatmul.msk.bf16.gmra.mxu1 %vm89_vm0, %v217_v14  ;;  %v3069_v54 = vpop.permute.xlu0 %338 }
 0x13e   :  { %v3043_v24 = vpop.permute.xlu2 %346 }
 0x146   :  { %v3056_v42 = vpop.permute.xlu2 %344 }
 0x14e   :  { %v3067_v53 = vpop.permute.xlu2 %340 }
 0x1a8   :  { %v287_v26 = vpop.f32.mrf.mxu0  ;;  %v306_v28 = vpop.f32.mrf.mxu1 }
 0x1a9   :  { %v3050_v33 = vadd.f32 %v287_v26, %v228_v32  ;;  %v307_v63 = vadd.f32 %v306_v28, %v229_v52 }
 0x1ab   :  { %v390_v43 = vmul.f32 %v3052_v34, %v3050_v33 }
 0x1b0   :  { %v289_v35 = vpop.f32.mrf.mxu0  ;;  %v308_v38 = vpop.f32.mrf.mxu1 }
 0x1b1   :  { %v3054_v39 = vadd.f32 %v289_v35, %v228_v32  ;;  %v309_v58 = vadd.f32 %v308_v38, %v229_v52 }
 0x1b3   :  { %v391_v44 = vmul.f32 %v3048_v29, %v3054_v39  ;;  %v316_v47 = vpack.c.bf16 %v3054_v39, %v3050_v33  ;;  %v419_v28 = vmul.f32 %v309_v58, %v2898_v10 }
 0x1b5   :  { %v402_v46 = vpack.c.bf16 %v391_v44, %v390_v43  ;;  %v3092_v44 = vpop.permute.xlu2 %336 }
 0x1b7   :  { %446 = vrot.lane.b32.xlu0 %v402_v46, %s2635_s26  ;;  %v418_v46 = vmul.f32 %v307_v63, %v2893_v9 }
 0x1b8   :  { %v292_v48 = vpop.f32.mrf.mxu0  ;;  %v311_v51 = vpop.f32.mrf.mxu1 }
 0x1b9   :  { %v3071_v21 = vadd.f32 %v292_v48, %v228_v32  ;;  %v312_v55 = vadd.f32 %v311_v51, %v229_v52  ;;  %v3098_v51 = vpop.permute.xlu0 %334 }
 0x1bb   :  { %v420_v4 = vmul.f32 %v312_v55, %v2875_v1  ;;  %v388_v5 = vmul.f32 %v3043_v24, %v3071_v21  ;;  %v396_v6 = vmul.f32 %v3031_v30, %v3071_v21  ;;  %v384_v7 = vmul.f32 %v3069_v54, %v3071_v21 }
 0x1c0   :  { %v294_v59 = vpop.f32.mrf.mxu0  ;;  %v313_v31 = vpop.f32.mrf.mxu1 }
 0x1c1   :  { %v3075_v0 = vadd.f32 %v294_v59, %v228_v32  ;;  %v314_v2 = vadd.f32 %v313_v31, %v229_v52  ;;  %v383_v52 = vmul.f32 %v3092_v44, %v3054_v39  ;;  %v428_v59 = vpack.c.bf16 %v419_v28, %v418_v46 }
 0x1c2   :  { %v414_v28 = vmul.f32 %v307_v63, %v2928_v23 }
 0x1c3   :  { %v389_v8 = vmul.f32 %v3073_v56, %v3075_v0  ;;  %v421_v14 = vmul.f32 %v314_v2, %v2804_v36  ;;  %v397_v25 = vmul.f32 %v3035_v20, %v3075_v0  ;;  %v385_v26 = vmul.f32 %v3067_v53, %v3075_v0 }
 0x1c4   :  { %v317_v48 = vpack.c.bf16 %v3075_v0, %v3071_v21  ;;  %v417_v31 = vmul.f32 %v314_v2, %v2919_v19 }
 0x1c5   :  { %v429_v32 = vpack.c.bf16 %v421_v14, %v420_v4  ;;  %v401_v35 = vpack.c.bf16 %v389_v8, %v388_v5  ;;  %v405_v38 = vpack.c.bf16 %v397_v25, %v396_v6  ;;  %v399_v43 = vpack.c.bf16 %v385_v26, %v384_v7 }
 0x1c6   :  { %v395_v4 = vmul.f32 %v3033_v16, %v3054_v39  ;;  %v382_v5 = vmul.f32 %v3098_v51, %v3050_v33  ;;  %v416_v6 = vmul.f32 %v312_v55, %v2812_v37  ;;  %v394_v7 = vmul.f32 %v3041_v22, %v3050_v33 }
 0x1c7   :  { %554 = vmatpush.bf16.msrb.mxu0 %v429_v32  ;;  %444 = vrot.lane.b32.xlu2 %v401_v35, %s2635_s26  ;;  %v415_v25 = vmul.f32 %v309_v58, %v2843_v50  ;;  %v413_v35 = vmul.f32 %v314_v2, %v2961_v41  ;;  %v393_v37 = vmul.f32 %v3037_v17, %v3075_v0  ;;  %v198_v0 = vld [vmem:[%s3752_s14 + $0x18] sm:$0xff] }
 0x1c8   :  { %452 = vrot.lane.b32.xlu1 %v405_v38, %s2635_s26  ;;  %440 = vrot.lane.b32.xlu0 %v399_v43, %s2635_s26  ;;  %v427_v8 = vpack.c.bf16 %v417_v31, %v416_v6  ;;  %v398_v14 = vpack.c.bf16 %v383_v52, %v382_v5  ;;  %v404_v26 = vpack.c.bf16 %v395_v4, %v394_v7 }
 0x1c9   :  { %v426_v32 = vpack.c.bf16 %v415_v25, %v414_v28  ;;  %v412_v38 = vmul.f32 %v312_v55, %v2956_v40  ;;  %v392_v43 = vmul.f32 %v3039_v18, %v3071_v21  ;;  %v411_v52 = vmul.f32 %v309_v58, %v2977_v49 }
 0x1ca   :  { %v410_v31 = vmul.f32 %v307_v63, %v2880_v3  ;;  %v409_v5 = vmul.f32 %v314_v2, %v2988_v57  ;;  %v387_v6 = vmul.f32 %v3056_v42, %v3054_v39  ;;  %v408_v7 = vmul.f32 %v312_v55, %v2908_v13  ;;  %v197_v39 = vld [vmem:[%s3752_s14 + $0x10] sm:$0xff] }
 0x1cb   :  { %555 = vmatpush.bf16.msrb.mxu0 %v428_v59  ;;  %v425_v46 = vpack.c.bf16 %v413_v35, %v412_v38  ;;  %v403_v59 = vpack.c.bf16 %v393_v37, %v392_v43  ;;  %v407_v25 = vmul.f32 %v309_v58, %v3006_v62  ;;  %v406_v28 = vmul.f32 %v307_v63, %v2939_v27 }
 0x1cc   :  { %v424_v4 = vpack.c.bf16 %v411_v52, %v410_v31 }
 0x1cf   :  { %556 = vmatpush.bf16.msrb.mxu0 %v427_v8  ;;  %438 = vrot.lane.b32.xlu2 %v398_v14, %s2635_s26  ;;  %v386_v8 = vmul.f32 %v3062_v45, %v3050_v33  ;;  %v423_v14 = vpack.c.bf16 %v409_v5, %v408_v7 }
 0x1d0   :  { %450 = vrot.lane.b32.xlu1 %v404_v26, %s2635_s26 }
 0x1d1   :  { %v400_v26 = vpack.c.bf16 %v387_v6, %v386_v8  ;;  %v195_v8 = vld [vmem:[%s3752_s14] sm:$0xff] }
 0x1d3   :  { %557 = vmatpush.bf16.msrb.mxu0 %v426_v32  ;;  %v422_v32 = vpack.c.bf16 %v407_v25, %v406_v28 }
 0x1d7   :  { %558 = vmatpush.bf16.msrb.mxu0 %v425_v46 }
 0x1d8   :  { %448 = vrot.lane.b32.xlu1 %v403_v59, %s2635_s26 }
 0x1db   :  { %559 = vmatpush.bf16.msrb.mxu0 %v424_v4 }
 0x1df   :  { %560 = vmatpush.bf16.msrb.mxu0 %v423_v14 }
 0x1e0   :  { %442 = vrot.lane.b32.xlu1 %v400_v26, %s2635_s26  ;;  %v196_v26 = vld [vmem:[%s3752_s14 + $0x8] sm:$0xff] }
 0x1e3   :  { %561 = vmatpush.bf16.msrb.mxu0 %v422_v32 }
 0x221   :  { %v445_v63 = vpop.permute.xlu2 %444 }
 0x222   :  { %v470_v52 = vsel %vm89_vm0, %v445_v63, 0 }
 0x229   :  { %v447_v58 = vpop.permute.xlu0 %446  ;;  %v439_v6 = vpop.permute.xlu2 %438 }
 0x22a   :  { %v473_v46 = vsel %vm89_vm0, %v447_v58, 0  ;;  %v461_v7 = vsel %vm89_vm0, %v439_v6, 0 }
 0x23a   :  { %v453_v2 = vpop.permute.xlu1 %452  ;;  %v441_v4 = vpop.permute.xlu0 %440 }
 0x23b   :  { %v482_v35 = vsel %vm89_vm0, %v453_v2, 0  ;;  %v464_v5 = vsel %vm89_vm0, %v441_v4, 0 }
 0x23c   :  { %484 = vmatpush.bf16.xpose.msra.mxu2 %v482_v35 }
 0x242   :  { %v451_v37 = vpop.permute.xlu1 %450 }
 0x243   :  { %v479_v55 = vsel %vm89_vm0, %v451_v37, 0 }
 0x244   :  { %485 = vmatpush.bf16.xpose.msra.mxu2 %v479_v55  ;;  %v2339_v55 = vld [vmem:[%s3730_s9 + $0x18] sm:$0xff] }
 0x245   :  { %626 = vmatpush.bf16.msrb.mxu1 %v2339_v55 }
 0x24a   :  { %v449_v38 = vpop.permute.xlu1 %448 }
 0x24b   :  { %v476_v43 = vsel %vm89_vm0, %v449_v38, 0 }
 0x24c   :  { %486 = vmatpush.bf16.xpose.msra.mxu2 %v476_v43  ;;  %v2338_v43 = vld [vmem:[%s3730_s9 + $0x10] sm:$0xff] }
 0x24d   :  { %627 = vmatpush.bf16.msrb.mxu1 %v2338_v43 }
 0x252   :  { %v443_v59 = vpop.permute.xlu1 %442 }
 0x253   :  { %v467_v31 = vsel %vm89_vm0, %v443_v59, 0 }
 0x254   :  { %487 = vmatpush.bf16.xpose.msra.mxu2 %v473_v46 }
 0x25c   :  { %488 = vmatpush.bf16.xpose.msra.mxu2 %v470_v52 }
 0x264   :  { %489 = vmatpush.bf16.xpose.msra.mxu2 %v467_v31 }
 0x26c   :  { %490 = vmatpush.bf16.xpose.msra.mxu2 %v464_v5 }
 0x274   :  { %491 = vmatpush.bf16.xpose.msra.mxu2 %v461_v7 }
 0x27b   :  { %2084 = vmatmul.msk.bf16.vlgmr.msra.gmra.mxu2 %vm89_vm0, %v316_v47 }
 0x28b   :  { %2085 = vmatmul.msk.bf16.gmra.mxu2 %vm89_vm0, %v317_v48 }
 0x2fe   :  { %v493_v14 = vpop.f32.mrf.mxu2 }
 0x2ff   :  { %v494_v25 = vadd.f32 %v493_v14, %v195_v8 }
 0x301   :  { %503 = vmax.xlane.f32.xlu1 %v494_v25 }
 0x306   :  { %v495_v28 = vpop.f32.mrf.mxu2 }
 0x307   :  { %v496_v33 = vadd.f32 %v495_v28, %v196_v26  ;;  %v2337_v28 = vld [vmem:[%s3730_s9 + $0x8] sm:$0xff] }
 0x308   :  { %628 = vmatpush.bf16.msrb.mxu1 %v2337_v28 }
 0x309   :  { %505 = vmax.xlane.f32.xlu0 %v496_v33 }
 0x30e   :  { %v498_v47 = vpop.f32.mrf.mxu2 }
 0x30f   :  { %v499_v21 = vadd.f32 %v498_v47, %v197_v39 }
 0x311   :  { %507 = vmax.xlane.f32.xlu2 %v499_v21 }
 0x316   :  { %v500_v48 = vpop.f32.mrf.mxu2 }
 0x317   :  { %v501_v32 = vadd.f32 %v500_v48, %v198_v0 }
 0x319   :  { %509 = vmax.xlane.f32.xlu1 %v501_v32 }
 0x374   :  { %v504_v2 = vpop.xlane.xlu1 %503 }
 0x375   :  { %v511_v35 = vsub.f32 %v494_v25, %v504_v2 }
 0x377   :  { %v515_v37 = vmul.f32 1.442695, %v511_v35 }
 0x379   :  { %2418 = vpow2.f32 %v515_v37 }
 0x37c   :  { %v506_v38 = vpop.xlane.xlu0 %505 }
 0x37d   :  { %v512_v58 = vsub.f32 %v496_v33, %v506_v38  ;;  %v2336_v33 = vld [vmem:[%s3730_s9] sm:$0xff] }
 0x37e   :  { %629 = vmatpush.bf16.msrb.mxu1 %v2336_v33 }
 0x37f   :  { %v2419_v46 = vpop.eup %2418  ;;  %v517_v63 = vmul.f32 1.442695, %v512_v58 }
 0x380   :  { %539 = vmatmul.f32.vlgmr.msra.gmra.mxu3 %v2419_v46 }
 0x381   :  { %2420 = vpow2.f32 %v517_v63 }
 0x384   :  { %v508_v52 = vpop.xlane.xlu2 %507 }
 0x385   :  { %v513_v59 = vsub.f32 %v499_v21, %v508_v52 }
 0x387   :  { %v2421_v31 = vpop.eup %2420  ;;  %v519_v4 = vmul.f32 1.442695, %v513_v59 }
 0x388   :  { %542 = vmatmul.f32.gmra.mxu3 %v2421_v31  ;;  %v552_v5 = vpack.c.bf16 %v2421_v31, %v2419_v46 }
 0x389   :  { %2422 = vpow2.f32 %v519_v4  ;;  %v3179_v4 = vld [vmem:[%s3734_s13] sm:$0x3f] }
 0x38a   :  { %562 = vmatmul.bf16.vlgmr.msrb.gmra.mxu0 %v552_v5  ;;  %v591_v5 = vperm.slane %v3179_v4, 0 }
 0x38c   :  { %v510_v6 = vpop.xlane.xlu1 %509 }
 0x38d   :  { %v514_v7 = vsub.f32 %v501_v32, %v510_v6 }
 0x38f   :  { %v2423_v8 = vpop.eup %2422  ;;  %v521_v14 = vmul.f32 1.442695, %v514_v7 }
 0x390   :  { %545 = vmatmul.f32.gmra.mxu3 %v2423_v8 }
 0x391   :  { %2424 = vpow2.f32 %v521_v14 }
 0x397   :  { %v2425_v25 = vpop.eup %2424 }
 0x398   :  { %548 = vmatmul.f32.gmra.mxu3 %v2425_v25  ;;  %v553_v26 = vpack.c.bf16 %v2425_v25, %v2423_v8 }
 0x39a   :  { %567 = vmatmul.bf16.gmra.mxu0 %v553_v26 }
 0x403   :  { %v540_v39 = vpop.f32.mrf.mxu3 }
 0x404   :  { %2426 = vrcp.f32 %v540_v39 }
 0x407   :  { %v563_v47 = vpop.f32.mrf.mxu0 }
 0x40a   :  { %v2427_v48 = vpop.eup %2426 }
 0x40b   :  { %v543_v21 = vpop.f32.mrf.mxu3  ;;  %v577_v2 = vmul.f32 %v2427_v48, %v563_v47 }
 0x40c   :  { %2428 = vrcp.f32 %v543_v21 }
 0x40f   :  { %v565_v0 = vpop.f32.mrf.mxu0 }
 0x412   :  { %v2429_v32 = vpop.eup %2428 }
 0x413   :  { %v578_v35 = vmul.f32 %v2429_v32, %v565_v0  ;;  %v546_v37 = vpop.f32.mrf.mxu3 }
 0x414   :  { %2430 = vrcp.f32 %v546_v37 }
 0x415   :  { %v581_v55 = vpack.c.bf16 %v578_v35, %v577_v2 }
 0x417   :  { %2102 = vmatmul.msk.bf16.vlgmr.msrb.gmra.mxu1 %vm89_vm0, %v581_v55  ;;  %v568_v38 = vpop.f32.mrf.mxu0 }
 0x41a   :  { %v2431_v58 = vpop.eup %2430 }
 0x41b   :  { %v549_v43 = vpop.f32.mrf.mxu3  ;;  %v579_v52 = vmul.f32 %v2431_v58, %v568_v38 }
 0x41c   :  { %2432 = vrcp.f32 %v549_v43 }
 0x41f   :  { %v570_v63 = vpop.f32.mrf.mxu0 }
 0x422   :  { %v2433_v46 = vpop.eup %2432 }
 0x423   :  { %v580_v59 = vmul.f32 %v2433_v46, %v570_v63 }
 0x425   :  { %v582_v31 = vpack.c.bf16 %v580_v59, %v579_v52 }
 0x427   :  { %2103 = vmatmul.msk.bf16.gmra.mxu1 %vm89_vm0, %v582_v31 }
 0x494   :  { %v631_v6 = vpop.f32.mrf.mxu1 }
 0x495   :  { %v632_v7 = vadd.f32 %v631_v6, %v591_v5 }
 0x497   :  { %v641_v8 = vadd.f32 %v632_v7, %v2999_v60 }
 0x499   :  { %v645_v14 = vsel %vm89_vm0, %v641_v8, 0.0 }
 0x49a   :  { %646 = vadd.xlane.f32.xlu0 %v645_v14 }
 0x49c   :  { %v633_v25 = vpop.f32.mrf.mxu1 }
 0x49d   :  { %v634_v26 = vadd.f32 %v633_v25, %v591_v5 }
 0x49f   :  { %v642_v28 = vadd.f32 %v634_v26, %v3001_v61  ;;  %v2343_v26 = vld [vmem:[%s3731_s10 + $0x18] sm:$0xff] }
 0x4a0   :  { %791 = vmatpush.bf16.msrb.mxu3 %v2343_v26 }
 0x4a1   :  { %v648_v33 = vsel %vm89_vm0, %v642_v28, 0.0 }
 0x4a2   :  { %649 = vadd.xlane.f32.xlu2 %v648_v33 }
 0x4a4   :  { %v636_v39 = vpop.f32.mrf.mxu1 }
 0x4a5   :  { %v637_v47 = vadd.f32 %v636_v39, %v591_v5 }
 0x4a7   :  { %v643_v21 = vadd.f32 %v637_v47, %v3025_v12  ;;  %v2341_v47 = vld [vmem:[%s3731_s10 + $0x8] sm:$0xff] }
 0x4a9   :  { %v651_v0 = vsel %vm89_vm0, %v643_v21, 0.0 }
 0x4aa   :  { %652 = vadd.xlane.f32.xlu1 %v651_v0  ;;  %v2340_v0 = vld [vmem:[%s3731_s10] sm:$0xff] }
 0x4ac   :  { %v638_v48 = vpop.f32.mrf.mxu1 }
 0x4ad   :  { %v639_v32 = vadd.f32 %v638_v48, %v591_v5 }
 0x4af   :  { %v644_v60 = vadd.f32 %v639_v32, %v3021_v11 }
 0x4b1   :  { %v654_v2 = vsel %vm89_vm0, %v644_v60, 0.0 }
 0x4b2   :  { %655 = vadd.xlane.f32.xlu0 %v654_v2 }
 0x50d   :  { %v647_v35 = vpop.xlane.xlu0 %646 }
 0x50e   :  { %v657_v61 = vmul.f32 %v647_v35, %v2775_v15 }
 0x510   :  { %v661_v37 = vsub.f32 %v641_v8, %v657_v61 }
 0x512   :  { %v665_v55 = vmul.f32 %v661_v37, %v661_v37 }
 0x514   :  { %v669_v38 = vsel %vm89_vm0, %v665_v55, 0.0 }
 0x515   :  { %v650_v43 = vpop.xlane.xlu2 %649  ;;  %670 = vadd.xlane.f32.xlu2 %v669_v38 }
 0x516   :  { %v658_v12 = vmul.f32 %v650_v43, %v2775_v15 }
 0x518   :  { %v3193_v58 = vsub.f32 %v642_v28, %v658_v12  ;;  %v2342_v28 = vld [vmem:[%s3731_s10 + $0x10] sm:$0xff] }
 0x519   :  { %792 = vmatpush.bf16.msrb.mxu3 %v2342_v28 }
 0x51a   :  { %v666_v46 = vmul.f32 %v3193_v58, %v3193_v58 }
 0x51c   :  { %v672_v11 = vsel %vm89_vm0, %v666_v46, 0.0 }
 0x51d   :  { %673 = vadd.xlane.f32.xlu1 %v672_v11  ;;  %v653_v63 = vpop.xlane.xlu1 %652  ;;  %793 = vmatpush.bf16.msrb.mxu3 %v2341_v47 }
 0x51e   :  { %v659_v52 = vmul.f32 %v653_v63, %v2775_v15 }
 0x520   :  { %v3199_v59 = vsub.f32 %v643_v21, %v659_v52 }
 0x521   :  { %794 = vmatpush.bf16.msrb.mxu3 %v2340_v0 }
 0x522   :  { %v667_v31 = vmul.f32 %v3199_v59, %v3199_v59 }
 0x524   :  { %v675_v5 = vsel %vm89_vm0, %v667_v31, 0.0 }
 0x525   :  { %v656_v6 = vpop.xlane.xlu0 %655  ;;  %676 = vadd.xlane.f32.xlu0 %v675_v5 }
 0x526   :  { %v660_v7 = vmul.f32 %v656_v6, %v2775_v15 }
 0x528   :  { %v3205_v8 = vsub.f32 %v644_v60, %v660_v7 }
 0x52a   :  { %v668_v14 = vmul.f32 %v3205_v8, %v3205_v8 }
 0x52c   :  { %v678_v25 = vsel %vm89_vm0, %v668_v14, 0.0 }
 0x52d   :  { %679 = vadd.xlane.f32.xlu2 %v678_v25 }
 0x588   :  { %v671_v33 = vpop.xlane.xlu2 %670 }
 0x589   :  { %v681_v39 = vmul.f32 %v671_v33, %v2775_v15 }
 0x58b   :  { %v685_v21 = vadd.f32 1e-12, %v681_v39  ;;  %v733_v39 = vperm.slane %v3179_v4, 1 }
 0x58d   :  { %2434 = vrsqrt.f32 %v685_v21  ;;  %vm695_vm15 = vweird.f32 %v685_v21 }
 0x590   :  { %v674_v48 = vpop.xlane.xlu1 %673 }
 0x591   :  { %v682_v32 = vmul.f32 %v674_v48, %v2775_v15 }
 0x593   :  { %v2435_v60 = vpop.eup %2434  ;;  %v686_v2 = vadd.f32 1e-12, %v682_v32 }
 0x594   :  { %v690_v35 = vmul.f32 %v2435_v60, %v685_v21  ;;  %vm696_vm14 = vweird.f32 %v2435_v60 }
 0x595   :  { %2436 = vrsqrt.f32 %v686_v2  ;;  %vm697_vm1 = vmor %vm695_vm15, %vm696_vm14  ;;  %vm705_vm3 = vweird.f32 %v686_v2 }
 0x596   :  { %v691_v61 = vmul.f32 %v2435_v60, %v690_v35  ;;  %v738_v35 = vperm.slane %v3179_v4, 2 }
 0x598   :  { %v692_v55 = vmul.f32 0.5, %v691_v61  ;;  %v677_v38 = vpop.xlane.xlu0 %676 }
 0x599   :  { %v683_v43 = vmul.f32 %v677_v38, %v2775_v15 }
 0x59a   :  { %v693_v12 = vsub.f32 1.5, %v692_v55 }
 0x59b   :  { %v2437_v46 = vpop.eup %2436  ;;  %v687_v11 = vadd.f32 1e-12, %v683_v43 }
 0x59c   :  { %v694_v63 = vmul.f32 %v2435_v60, %v693_v12  ;;  %v700_v52 = vmul.f32 %v2437_v46, %v686_v2  ;;  %vm706_vm2 = vweird.f32 %v2437_v46 }
 0x59d   :  { %2438 = vrsqrt.f32 %v687_v11  ;;  %vm707_vm4 = vmor %vm705_vm3, %vm706_vm2  ;;  %vm715_vm6 = vweird.f32 %v687_v11 }
 0x59e   :  { %v701_v31 = vmul.f32 %v2437_v46, %v700_v52  ;;  %v698_v5 = vsel %vm697_vm1, %v2435_v60, %v694_v63 }
 0x59f   :  { %v729_v28 = vmul.f32 %v698_v5, %v661_v37 }
 0x5a0   :  { %v702_v6 = vmul.f32 0.5, %v701_v31  ;;  %v680_v7 = vpop.xlane.xlu2 %679 }
 0x5a1   :  { %v684_v14 = vmul.f32 %v680_v7, %v2775_v15  ;;  %v734_v60 = vmul.f32 %v733_v39, %v729_v28 }
 0x5a2   :  { %v703_v25 = vsub.f32 1.5, %v702_v6 }
 0x5a3   :  { %v2439_v26 = vpop.eup %2438  ;;  %v688_v33 = vadd.f32 1e-12, %v684_v14  ;;  %v3229_v37 = vadd.f32 %v738_v35, %v734_v60  ;;  %v2345_v60 = vld [vmem:[%s3733_s12 + $0x8] sm:$0xff] }
 0x5a4   :  { %v704_v47 = vmul.f32 %v2437_v46, %v703_v25  ;;  %v710_v0 = vmul.f32 %v2439_v26, %v687_v11  ;;  %vm716_vm5 = vweird.f32 %v2439_v26 }
 0x5a5   :  { %2440 = vrsqrt.f32 %v688_v33  ;;  %vm717_vm7 = vmor %vm715_vm6, %vm716_vm5  ;;  %vm725_vm9 = vweird.f32 %v688_v33 }
 0x5a6   :  { %v708_v21 = vsel %vm707_vm4, %v2437_v46, %v704_v47  ;;  %v711_v48 = vmul.f32 %v2439_v26, %v710_v0 }
 0x5a7   :  { %v730_v32 = vmul.f32 %v708_v21, %v3193_v58  ;;  %v2347_v21 = vld [vmem:[%s3733_s12 + $0x18] sm:$0xff] }
 0x5a8   :  { %v712_v61 = vmul.f32 0.5, %v711_v48  ;;  %v2346_v48 = vld [vmem:[%s3733_s12 + $0x10] sm:$0xff] }
 0x5a9   :  { %v735_v55 = vmul.f32 %v733_v39, %v730_v32  ;;  %v2405_v32 = vld [vmem:[%s3732_s11] ss:$0 sm:$0xff] }
 0x5aa   :  { %v713_v38 = vsub.f32 1.5, %v712_v61 }
 0x5ab   :  { %v2441_v43 = vpop.eup %2440  ;;  %v3231_v12 = vadd.f32 %v738_v35, %v735_v55  ;;  %v2344_v55 = vld [vmem:[%s3733_s12] sm:$0xff] }
 0x5ac   :  { %v714_v63 = vmul.f32 %v2439_v26, %v713_v38  ;;  %v720_v2 = vmul.f32 %v2441_v43, %v688_v33  ;;  %vm726_vm8 = vweird.f32 %v2441_v43  ;;  %v2349_v33 = vld [vmem:[%s3733_s12 + $0x28] sm:$0xff] }
 0x5ad   :  { %v743_v46 = vpack.c.bf16 %v3231_v12, %v3229_v37  ;;  %vm727_vm10 = vmor %vm725_vm9, %vm726_vm8 }
 0x5ae   :  { %v721_v52 = vmul.f32 %v2441_v43, %v720_v2  ;;  %v718_v58 = vsel %vm717_vm7, %v2439_v26, %v714_v63 }
 0x5af   :  { %2120 = vmatmul.msk.bf16.vlgmr.msrb.gmra.mxu3 %vm89_vm0, %v743_v46  ;;  %v731_v6 = vmul.f32 %v718_v58, %v3199_v59  ;;  %v2351_v59 = vld [vmem:[%s3733_s12 + $0x38] sm:$0xff] }
 0x5b0   :  { %v722_v31 = vmul.f32 0.5, %v721_v52  ;;  %909 = vmatpush.bf16.msra.mxu0 %v2351_v59 }
 0x5b1   :  { %v736_v28 = vmul.f32 %v733_v39, %v731_v6 }
 0x5b2   :  { %v723_v5 = vsub.f32 1.5, %v722_v31 }
 0x5b3   :  { %v3238_v0 = vadd.f32 %v738_v35, %v736_v28 }
 0x5b4   :  { %v724_v7 = vmul.f32 %v2441_v43, %v723_v5 }
 0x5b6   :  { %v728_v14 = vsel %vm727_vm10, %v2441_v43, %v724_v7 }
 0x5b7   :  { %v732_v25 = vmul.f32 %v728_v14, %v3205_v8  ;;  %v2350_v8 = vld [vmem:[%s3733_s12 + $0x30] sm:$0xff] }
 0x5b8   :  { %910 = vmatpush.bf16.msra.mxu0 %v2350_v8 }
 0x5b9   :  { %v737_v47 = vmul.f32 %v733_v39, %v732_v25  ;;  %v2348_v39 = vld [vmem:[%s3733_s12 + $0x20] sm:$0xff] }
 0x5bb   :  { %v3240_v11 = vadd.f32 %v738_v35, %v737_v47 }
 0x5bc   :  { %911 = vmatpush.bf16.msra.mxu0 %v2349_v33 }
 0x5bd   :  { %v744_v26 = vpack.c.bf16 %v3240_v11, %v3238_v0 }
 0x5bf   :  { %2121 = vmatmul.msk.bf16.gmra.mxu3 %vm89_vm0, %v744_v26 }
 0x5c0   :  { %912 = vmatpush.bf16.msra.mxu0 %v2348_v39 }
 0x5c4   :  { %913 = vmatpush.bf16.msra.mxu0 %v2347_v21 }
 0x5c8   :  { %914 = vmatpush.bf16.msra.mxu0 %v2346_v48 }
 0x5cc   :  { %915 = vmatpush.bf16.msra.mxu0 %v2345_v60 }
 0x5d0   :  { %916 = vmatpush.bf16.msra.mxu0 %v2344_v55 }
 0x5d4   :  { %1277 = vmatpush.msrb.mxu0 %v2804_v36  ;;  %v3280_v36 = vld [vmem:[%s3751_s24 + $0x50] sm:$0xff] }
 0x5d6   :  { %1278 = vmatpush.msrb.mxu0 %v2875_v1 }
 0x5d8   :  { %1279 = vmatpush.msrb.mxu0 %v2898_v10 }
 0x5da   :  { %1280 = vmatpush.msrb.mxu0 %v2893_v9 }
 0x5dc   :  { %1281 = vmatpush.msrb.mxu0 %v2919_v19 }
 0x5de   :  { %1282 = vmatpush.msrb.mxu0 %v3280_v36 }
 0x5e0   :  { %1283 = vmatpush.msrb.mxu0 %v2843_v50 }
 0x5e2   :  { %1284 = vmatpush.msrb.mxu0 %v2928_v23 }
 0x5e4   :  { %1285 = vmatpush.msrb.mxu0 %v2961_v41 }
 0x5e6   :  { %1286 = vmatpush.msrb.mxu0 %v2956_v40 }
 0x5e8   :  { %1287 = vmatpush.msrb.mxu0 %v2977_v49 }
 0x5ea   :  { %1288 = vmatpush.msrb.mxu0 %v2880_v3 }
 0x5ec   :  { %1289 = vmatpush.msrb.mxu0 %v2988_v57 }
 0x5ee   :  { %1290 = vmatpush.msrb.mxu0 %v2908_v13 }
 0x5f0   :  { %1291 = vmatpush.msrb.mxu0 %v3006_v62 }
 0x5f2   :  { %1292 = vmatpush.msrb.mxu0 %v2939_v27 }
 0x632   :  { %v796_v35 = vpop.f32.mrf.mxu3 }
 0x633   :  { %v797_v61 = vadd.f32 %v2405_v32, %v796_v35 }
 0x635   :  { %v806_v38 = vmul.f32 %v797_v61, %v797_v61 }
 0x637   :  { %v810_v43 = vmul.f32 %v806_v38, %v797_v61 }
 0x639   :  { %v814_v63 = vmul.f32 0.044715, %v810_v43 }
 0x63a   :  { %v798_v2 = vpop.f32.mrf.mxu3 }
 0x63b   :  { %v818_v46 = vadd.f32 %v814_v63, %v797_v61  ;;  %v799_v52 = vadd.f32 %v2405_v32, %v798_v2 }
 0x63d   :  { %v822_v58 = vmul.f32 0.7978846, %v818_v46  ;;  %v807_v31 = vmul.f32 %v799_v52, %v799_v52 }
 0x63f   :  { %v811_v5 = vmul.f32 %v807_v31, %v799_v52  ;;  %2442 = vtanh.f32 %v822_v58 }
 0x641   :  { %v815_v6 = vmul.f32 0.044715, %v811_v5 }
 0x642   :  { %v801_v1 = vpop.f32.mrf.mxu3 }
 0x643   :  { %v819_v7 = vadd.f32 %v815_v6, %v799_v52  ;;  %v802_v14 = vadd.f32 %v2405_v32, %v801_v1 }
 0x645   :  { %v823_v10 = vmul.f32 0.7978846, %v819_v7  ;;  %v808_v25 = vmul.f32 %v802_v14, %v802_v14  ;;  %v2443_v9 = vpop.eup %2442 }
 0x646   :  { %v830_v47 = vadd.f32 1.0, %v2443_v9 }
 0x647   :  { %2444 = vtanh.f32 %v823_v10  ;;  %v812_v19 = vmul.f32 %v808_v25, %v802_v14 }
 0x648   :  { %v834_v23 = vmul.f32 0.5, %v830_v47 }
 0x649   :  { %v816_v28 = vmul.f32 0.044715, %v812_v19 }
 0x64a   :  { %v803_v26 = vpop.f32.mrf.mxu3  ;;  %v838_v40 = vmul.f32 %v834_v23, %v797_v61  ;;  %v860_v61 = vperm.slane %v3179_v4, 3 }
 0x64b   :  { %v820_v59 = vadd.f32 %v816_v28, %v802_v14  ;;  %v804_v8 = vadd.f32 %v2405_v32, %v803_v26 }
 0x64d   :  { %v2445_v33 = vpop.eup %2444  ;;  %v809_v50 = vmul.f32 %v804_v8, %v804_v8  ;;  %v824_v39 = vmul.f32 0.7978846, %v820_v59 }
 0x64e   :  { %v831_v21 = vadd.f32 1.0, %v2445_v33 }
 0x64f   :  { %v813_v48 = vmul.f32 %v809_v50, %v804_v8  ;;  %2446 = vtanh.f32 %v824_v39 }
 0x650   :  { %v835_v41 = vmul.f32 0.5, %v831_v21 }
 0x651   :  { %v817_v60 = vmul.f32 0.044715, %v813_v48 }
 0x652   :  { %v839_v35 = vmul.f32 %v835_v41, %v799_v52 }
 0x653   :  { %v821_v32 = vadd.f32 %v817_v60, %v804_v8 }
 0x654   :  { %v842_v49 = vpack.c.bf16 %v839_v35, %v838_v40 }
 0x655   :  { %v825_v55 = vmul.f32 0.7978846, %v821_v32  ;;  %v2447_v3 = vpop.eup %2446 }
 0x656   :  { %917 = vmatmul.bf16.vlgmr.msra.gmra.mxu0 %v842_v49  ;;  %v832_v38 = vadd.f32 1.0, %v2447_v3 }
 0x657   :  { %2448 = vtanh.f32 %v825_v55 }
 0x658   :  { %v836_v63 = vmul.f32 0.5, %v832_v38  ;;  %v2190_v38 = vld [vmem:[%s3728_s7 + $0x70] sm:$0xf] }
 0x65a   :  { %v840_v46 = vmul.f32 %v836_v63, %v802_v14 }
 0x65d   :  { %v2449_v43 = vpop.eup %2448 }
 0x65e   :  { %v833_v57 = vadd.f32 1.0, %v2449_v43  ;;  %v2359_v43 = vld [vmem:[%s3728_s7 + $0x74] sm:$0xf0] }
 0x65f   :  { %v2191_v63 = vor.u32 %v2359_v43, %v2190_v38 }
 0x660   :  { %v837_v2 = vmul.f32 0.5, %v833_v57  ;;  %v2358_v57 = vld [vmem:[%s3728_s7 + $0x74] sm:$0xf] }
 0x661   :  { %1100 = vmatpush.bf16.msra.mxu1 %v2191_v63 }
 0x662   :  { %v841_v58 = vmul.f32 %v837_v2, %v804_v8  ;;  %v2192_v2 = vld [vmem:[%s3728_s7 + $0x78] sm:$0xf0] }
 0x664   :  { %v843_v13 = vpack.c.bf16 %v841_v58, %v840_v46  ;;  %v2195_v46 = vor.u32 %v2358_v57, %v2192_v2  ;;  %v2182_v58 = vld [vmem:[%s3728_s7 + $0x60] sm:$0xf] }
 0x666   :  { %922 = vmatmul.bf16.gmra.mxu0 %v843_v13  ;;  %v2357_v13 = vld [vmem:[%s3728_s7 + $0x64] sm:$0xf0]  ;;  %1119 = vmatpush.bf16.msrb.mxu2 %v2195_v46 }
 0x6d3   :  { %v918_v52 = vpop.f32.mrf.mxu0 }
 0x6d4   :  { %v919_v62 = vadd.f32 %v918_v52, %v860_v61  ;;  %v2183_v52 = vor.u32 %v2357_v13, %v2182_v58  ;;  %v1020_v13 = vperm.slane %v3179_v4, 4 }
 0x6d6   :  { %v928_v31 = vadd.f32 %v919_v62, %v3229_v37  ;;  %v2184_v62 = vld [vmem:[%s3728_s7 + $0x68] sm:$0xf0]  ;;  %1101 = vmatpush.bf16.msra.mxu1 %v2183_v52 }
 0x6d8   :  { %v932_v27 = vsel %vm89_vm0, %v928_v31, 0.0 }
 0x6d9   :  { %933 = vadd.xlane.f32.xlu1 %v932_v27 }
 0x6db   :  { %v920_v5 = vpop.f32.mrf.mxu0 }
 0x6dc   :  { %v921_v6 = vadd.f32 %v920_v5, %v860_v61  ;;  %v2174_v5 = vld [vmem:[%s3728_s7 + $0x50] sm:$0xf] }
 0x6de   :  { %v929_v1 = vadd.f32 %v921_v6, %v3231_v12  ;;  %v2355_v6 = vld [vmem:[%s3728_s7 + $0x54] sm:$0xf0] }
 0x6e0   :  { %v935_v7 = vsel %vm89_vm0, %v929_v1, 0.0 }
 0x6e1   :  { %936 = vadd.xlane.f32.xlu0 %v935_v7 }
 0x6e3   :  { %v923_v14 = vpop.f32.mrf.mxu0 }
 0x6e4   :  { %v924_v10 = vadd.f32 %v923_v14, %v860_v61  ;;  %v2175_v14 = vor.u32 %v2355_v6, %v2174_v5  ;;  %v1025_v6 = vperm.slane %v3179_v4, 5 }
 0x6e6   :  { %v930_v25 = vadd.f32 %v924_v10, %v3238_v0  ;;  %v2176_v10 = vld [vmem:[%s3728_s7 + $0x58] sm:$0xf0]  ;;  %1102 = vmatpush.bf16.msra.mxu1 %v2175_v14 }
 0x6e8   :  { %v938_v9 = vsel %vm89_vm0, %v930_v25, 0.0 }
 0x6e9   :  { %939 = vadd.xlane.f32.xlu2 %v938_v9 }
 0x6eb   :  { %v925_v19 = vpop.f32.mrf.mxu0 }
 0x6ec   :  { %v926_v28 = vadd.f32 %v925_v19, %v860_v61  ;;  %v2356_v61 = vld [vmem:[%s3728_s7 + $0x64] sm:$0xf]  ;;  %v2166_v19 = vld [vmem:[%s3728_s7 + $0x40] sm:$0xf] }
 0x6ee   :  { %v931_v37 = vadd.f32 %v926_v28, %v3240_v11  ;;  %v2353_v28 = vld [vmem:[%s3728_s7 + $0x44] sm:$0xf0] }
 0x6f0   :  { %v941_v47 = vsel %vm89_vm0, %v931_v37, 0.0 }
 0x6f1   :  { %942 = vadd.xlane.f32.xlu1 %v941_v47  ;;  %v2167_v47 = vor.u32 %v2353_v28, %v2166_v19 }
 0x6f3   :  { %1103 = vmatpush.bf16.msra.mxu1 %v2167_v47 }
 0x74c   :  { %v934_v26 = vpop.xlane.xlu1 %933 }
 0x74d   :  { %v944_v12 = vmul.f32 %v934_v26, %v2775_v15  ;;  %v2168_v26 = vld [vmem:[%s3728_s7 + $0x48] sm:$0xf0] }
 0x74f   :  { %v3303_v59 = vsub.f32 %v928_v31, %v944_v12  ;;  %v2187_v31 = vor.u32 %v2356_v61, %v2184_v62 }
 0x751   :  { %v952_v8 = vmul.f32 %v3303_v59, %v3303_v59  ;;  %1120 = vmatpush.bf16.msrb.mxu2 %v2187_v31 }
 0x753   :  { %v956_v0 = vsel %vm89_vm0, %v952_v8, 0.0 }
 0x754   :  { %v937_v33 = vpop.xlane.xlu0 %936  ;;  %957 = vadd.xlane.f32.xlu0 %v956_v0 }
 0x755   :  { %v945_v50 = vmul.f32 %v937_v33, %v2775_v15 }
 0x757   :  { %v3309_v39 = vsub.f32 %v929_v1, %v945_v50  ;;  %v2354_v1 = vld [vmem:[%s3728_s7 + $0x54] sm:$0xf] }
 0x759   :  { %v953_v11 = vmul.f32 %v3309_v39, %v3309_v39 }
 0x75b   :  { %v959_v23 = vsel %vm89_vm0, %v953_v11, 0.0 }
 0x75c   :  { %v940_v21 = vpop.xlane.xlu2 %939  ;;  %960 = vadd.xlane.f32.xlu2 %v959_v23 }
 0x75d   :  { %v946_v48 = vmul.f32 %v940_v21, %v2775_v15 }
 0x75f   :  { %v3315_v41 = vsub.f32 %v930_v25, %v946_v48  ;;  %v2179_v25 = vor.u32 %v2354_v1, %v2176_v10 }
 0x761   :  { %v954_v60 = vmul.f32 %v3315_v41, %v3315_v41  ;;  %1121 = vmatpush.bf16.msrb.mxu2 %v2179_v25 }
 0x763   :  { %v962_v40 = vsel %vm89_vm0, %v954_v60, 0.0 }
 0x764   :  { %963 = vadd.xlane.f32.xlu1 %v962_v40  ;;  %v943_v35 = vpop.xlane.xlu1 %942 }
 0x765   :  { %v947_v32 = vmul.f32 %v943_v35, %v2775_v15 }
 0x767   :  { %v3321_v49 = vsub.f32 %v931_v37, %v947_v32  ;;  %v2352_v37 = vld [vmem:[%s3728_s7 + $0x44] sm:$0xf] }
 0x768   :  { %v2171_v12 = vor.u32 %v2352_v37, %v2168_v26 }
 0x769   :  { %v955_v55 = vmul.f32 %v3321_v49, %v3321_v49 }
 0x76a   :  { %1122 = vmatpush.bf16.msrb.mxu2 %v2171_v12 }
 0x76b   :  { %v965_v3 = vsel %vm89_vm0, %v955_v55, 0.0 }
 0x76c   :  { %966 = vadd.xlane.f32.xlu0 %v965_v3 }
 0x7c7   :  { %v958_v27 = vpop.xlane.xlu0 %957 }
 0x7c8   :  { %v968_v7 = vmul.f32 %v958_v27, %v2775_v15 }
 0x7ca   :  { %v972_v9 = vadd.f32 1e-12, %v968_v7 }
 0x7cc   :  { %2450 = vrsqrt.f32 %v972_v9  ;;  %vm982_vm12 = vweird.f32 %v972_v9 }
 0x7cf   :  { %v961_v8 = vpop.xlane.xlu2 %960 }
 0x7d0   :  { %v969_v0 = vmul.f32 %v961_v8, %v2775_v15 }
 0x7d2   :  { %v2451_v33 = vpop.eup %2450  ;;  %v973_v50 = vadd.f32 1e-12, %v969_v0 }
 0x7d3   :  { %v977_v11 = vmul.f32 %v2451_v33, %v972_v9  ;;  %vm983_vm11 = vweird.f32 %v2451_v33 }
 0x7d4   :  { %2452 = vrsqrt.f32 %v973_v50  ;;  %vm984_vm13 = vmor %vm982_vm12, %vm983_vm11  ;;  %vm992_vm15 = vweird.f32 %v973_v50 }
 0x7d5   :  { %v978_v23 = vmul.f32 %v2451_v33, %v977_v11 }
 0x7d7   :  { %v979_v21 = vmul.f32 0.5, %v978_v23  ;;  %v964_v48 = vpop.xlane.xlu1 %963 }
 0x7d8   :  { %v970_v60 = vmul.f32 %v964_v48, %v2775_v15 }
 0x7d9   :  { %v980_v40 = vsub.f32 1.5, %v979_v21 }
 0x7da   :  { %v2453_v35 = vpop.eup %2452  ;;  %v974_v32 = vadd.f32 1e-12, %v970_v60 }
 0x7db   :  { %v981_v55 = vmul.f32 %v2451_v33, %v980_v40  ;;  %v987_v3 = vmul.f32 %v2453_v35, %v973_v50  ;;  %vm993_vm14 = vweird.f32 %v2453_v35 }
 0x7dc   :  { %2454 = vrsqrt.f32 %v974_v32  ;;  %vm994_vm1 = vmor %vm992_vm15, %vm993_vm14  ;;  %vm1002_vm3 = vweird.f32 %v974_v32 }
 0x7dd   :  { %v988_v38 = vmul.f32 %v2453_v35, %v987_v3  ;;  %v985_v43 = vsel %vm984_vm13, %v2451_v33, %v981_v55 }
 0x7de   :  { %v1016_v61 = vmul.f32 %v985_v43, %v3303_v59 }
 0x7df   :  { %v989_v57 = vmul.f32 0.5, %v988_v38  ;;  %v967_v63 = vpop.xlane.xlu0 %966 }
 0x7e0   :  { %v971_v2 = vmul.f32 %v967_v63, %v2775_v15  ;;  %v1021_v1 = vmul.f32 %v1020_v13, %v1016_v61 }
 0x7e1   :  { %v990_v46 = vsub.f32 1.5, %v989_v57 }
 0x7e2   :  { %v2455_v58 = vpop.eup %2454  ;;  %v975_v52 = vadd.f32 1e-12, %v971_v2  ;;  %v3382_v19 = vadd.f32 %v1025_v6, %v1021_v1 }
 0x7e3   :  { %v991_v62 = vmul.f32 %v2453_v35, %v990_v46  ;;  %v997_v31 = vmul.f32 %v2455_v58, %v974_v32  ;;  %vm1003_vm2 = vweird.f32 %v2455_v58 }
 0x7e4   :  { %2456 = vrsqrt.f32 %v975_v52  ;;  %vm1004_vm4 = vmor %vm1002_vm3, %vm1003_vm2  ;;  %vm1012_vm6 = vweird.f32 %v975_v52 }
 0x7e5   :  { %v995_v27 = vsel %vm994_vm1, %v2453_v35, %v991_v62  ;;  %v998_v5 = vmul.f32 %v2455_v58, %v997_v31 }
 0x7e6   :  { %v1017_v7 = vmul.f32 %v995_v27, %v3309_v39 }
 0x7e7   :  { %v999_v14 = vmul.f32 0.5, %v998_v5 }
 0x7e8   :  { %v1022_v10 = vmul.f32 %v1020_v13, %v1017_v7 }
 0x7e9   :  { %v1000_v25 = vsub.f32 1.5, %v999_v14 }
 0x7ea   :  { %v2457_v9 = vpop.eup %2456  ;;  %v3384_v59 = vadd.f32 %v1025_v6, %v1022_v10 }
 0x7eb   :  { %v1001_v28 = vmul.f32 %v2455_v58, %v1000_v25  ;;  %v1007_v37 = vmul.f32 %v2457_v9, %v975_v52  ;;  %vm1013_vm5 = vweird.f32 %v2457_v9 }
 0x7ec   :  { %v1032_v47 = vpack.c.bf16 %v3384_v59, %v3382_v19  ;;  %vm1014_vm7 = vmor %vm1012_vm6, %vm1013_vm5 }
 0x7ed   :  { %v1008_v26 = vmul.f32 %v2457_v9, %v1007_v37  ;;  %v1005_v4 = vsel %vm1004_vm4, %v2455_v58, %v1001_v28 }
 0x7ee   :  { %2196 = vmatmul.msk.bf16.vlgmr.msra.gmra.mxu1 %vm89_vm0, %v1032_v47  ;;  %2198 = vmatmul.msk.bf16.vlgmr.msrb.gmra.mxu2 %vm89_vm0, %v1032_v47  ;;  %v1018_v8 = vmul.f32 %v1005_v4, %v3315_v41  ;;  %v2163_v41 = vld [vmem:[%s3729_s8 + $0x2] sm:$0x3]  ;;  %s2640_s8 = smov [#allocation7]  }
 0x7ef   :  { %v1009_v39 = vmul.f32 0.5, %v1008_v26  ;;  %v1046_v35 = vperm.slane %v2163_v41, 0  ;;  %v1047_v31 = vperm.slane %v2163_v41, 1  ;;  %s2013_s1 = sshll.u32 %s2640_s8, 4  ;;  %s2014_s1 = int_to_ptr.vmem [resolvable:$true] %s2013_s1 }
 0x7f0   :  { %v1023_v11 = vmul.f32 %v1020_v13, %v1018_v8 }
 0x7f1   :  { %v1010_v12 = vsub.f32 1.5, %v1009_v39 }
 0x7f2   :  { %v3392_v21 = vadd.f32 %v1025_v6, %v1023_v11 }
 0x7f3   :  { %v1011_v0 = vmul.f32 %v2457_v9, %v1010_v12  ;;  %v2515_v12 = vld [vmem:[%s3751_s24 + $0x68] sm:$0xff] }
 0x7f5   :  { %v1015_v33 = vsel %vm1014_vm7, %v2457_v9, %v1011_v0 }
 0x7f6   :  { %v1019_v50 = vmul.f32 %v1015_v33, %v3321_v49 }
 0x7f8   :  { %v1024_v23 = vmul.f32 %v1020_v13, %v1019_v50 }
 0x7fa   :  { %v3394_v48 = vadd.f32 %v1025_v6, %v1024_v23 }
 0x7fc   :  { %v1033_v60 = vpack.c.bf16 %v3394_v48, %v3392_v21 }
 0x7fe   :  { %2197 = vmatmul.msk.bf16.gmra.mxu1 %vm89_vm0, %v1033_v60  ;;  %2199 = vmatmul.msk.bf16.gmra.mxu2 %vm89_vm0, %v1033_v60 }
 0x86b   :  { %v1105_v40 = vpop.f32.mrf.mxu1 }
 0x86c   :  { %v3403_v32 = vadd.f32 %v1105_v40, %v1046_v35 }
 0x86e   :  { %v1148_v38 = vmul.f32 %v3403_v32, %v3041_v22  ;;  %v1140_v13 = vmul.f32 %v3403_v32, %v3062_v45  ;;  %v1144_v4 = vmul.f32 %v3403_v32, %v3052_v34  ;;  %v1136_v40 = vmul.f32 %v3403_v32, %v3098_v51 }
 0x871   :  { %v1124_v49 = vpop.f32.mrf.mxu2 }
 0x873   :  { %v1107_v55 = vpop.f32.mrf.mxu1 }
 0x874   :  { %v3405_v3 = vadd.f32 %v1107_v55, %v1046_v35 }
 0x876   :  { %v1149_v43 = vmul.f32 %v3405_v3, %v3033_v16  ;;  %v1134_v57 = vpack.c.bf16 %v3405_v3, %v3403_v32  ;;  %v1141_v58 = vmul.f32 %v3405_v3, %v3056_v42  ;;  %v1145_v37 = vmul.f32 %v3405_v3, %v3048_v29  ;;  %v2516_v29 = vld [vmem:[%s3751_s24 + $0x60] sm:$0xff] }
 0x877   :  { %v1137_v23 = vmul.f32 %v3405_v3, %v3092_v44  ;;  %v2519_v44 = vld [vmem:[%s3751_s24 + $0x40] sm:$0xff] }
 0x878   :  { %v1158_v63 = vpack.c.bf16 %v1149_v43, %v1148_v38  ;;  %v1154_v61 = vpack.c.bf16 %v1141_v58, %v1140_v13  ;;  %v1156_v0 = vpack.c.bf16 %v1145_v37, %v1144_v4  ;;  %v2522_v58 = vld [vmem:[%s3751_s24 + $0x28] sm:$0xff] }
 0x879   :  { %v1126_v2 = vpop.f32.mrf.mxu2 }
 0x87a   :  { %1204 = vrot.lane.b32.xlu1 %v1158_v63, %s2635_s26  ;;  %v1127_v25 = vadd.f32 %v1126_v2, %v1047_v31  ;;  %v2521_v63 = vld [vmem:[%s3751_s24 + $0x30] sm:$0xff] }
 0x87b   :  { %v1110_v46 = vpop.f32.mrf.mxu1 }
 0x87c   :  { %v3418_v22 = vadd.f32 %v1110_v46, %v1046_v35  ;;  %v1173_v8 = vmul.f32 %v2515_v12, %v1127_v25  ;;  %v1165_v13 = vmul.f32 %v2522_v58, %v1127_v25 }
 0x87e   :  { %v1150_v27 = vmul.f32 %v3418_v22, %v3031_v30  ;;  %v1146_v42 = vmul.f32 %v3418_v22, %v3039_v18  ;;  %v1125_v30 = vadd.f32 %v1124_v49, %v1047_v31  ;;  %v2514_v18 = vld [vmem:[%s3751_s24 + $0x78] sm:$0xff]  ;;  %v1142_v39 = vmul.f32 %v3418_v22, %v3043_v24  ;;  %v2518_v49 = vld [vmem:[%s3751_s24 + $0x48] sm:$0xff] }
 0x87f   :  { %v2517_v24 = vld [vmem:[%s3751_s24 + $0x58] sm:$0xff]  ;;  %v1169_v55 = vmul.f32 %v2518_v49, %v1127_v25 }
 0x881   :  { %v1129_v52 = vpop.f32.mrf.mxu2 }
 0x882   :  { %1196 = vrot.lane.b32.xlu1 %v1154_v61, %s2635_s26  ;;  %v3433_v1 = vadd.f32 %v1129_v52, %v1047_v31  ;;  %v2523_v61 = vld [vmem:[%s3751_s24 + $0x20] sm:$0xff] }
 0x883   :  { %v1112_v16 = vpop.f32.mrf.mxu1  ;;  %v1164_v52 = vmul.f32 %v2523_v61, %v1125_v30 }
 0x884   :  { %v3421_v62 = vadd.f32 %v1112_v16, %v1046_v35  ;;  %v1170_v11 = vmul.f32 %v3280_v36, %v3433_v1  ;;  %v1138_v35 = vmul.f32 %v3418_v22, %v3069_v54  ;;  %v1152_v36 = vpack.c.bf16 %v1137_v23, %v1136_v40  ;;  %v2520_v54 = vld [vmem:[%s3751_s24 + $0x38] sm:$0xff] }
 0x885   :  { %v1166_v2 = vmul.f32 %v2521_v63, %v3433_v1  ;;  %v1178_v16 = vpack.c.bf16 %v1165_v13, %v1164_v52  ;;  %v2362_v52 = vld [vmem:[%s3730_s9 + $0x30] sm:$0xff] }
 0x886   :  { %v1151_v5 = vmul.f32 %v3421_v62, %v3035_v20  ;;  %v1147_v45 = vmul.f32 %v3421_v62, %v3037_v17  ;;  %v1135_v6 = vpack.c.bf16 %v3421_v62, %v3418_v22  ;;  %v2513_v20 = vld [vmem:[%s3751_s24 + $0x70] sm:$0xff]  ;;  %v1143_v47 = vmul.f32 %v3421_v62, %v3073_v56 }
 0x887   :  { %v1174_v17 = vmul.f32 %v2513_v20, %v3433_v1  ;;  %v1172_v56 = vmul.f32 %v2516_v29, %v1125_v30  ;;  %v1139_v60 = vmul.f32 %v3421_v62, %v3067_v53  ;;  %v1168_v53 = vmul.f32 %v2519_v44, %v1125_v30 }
 0x888   :  { %v1159_v7 = vpack.c.bf16 %v1151_v5, %v1150_v27  ;;  %v1157_v14 = vpack.c.bf16 %v1147_v45, %v1146_v42  ;;  %v1155_v33 = vpack.c.bf16 %v1143_v47, %v1142_v39  ;;  %v2525_v5 = vld [vmem:[%s3751_s24 + $0x10] sm:$0xff] }
 0x889   :  { %v1131_v10 = vpop.f32.mrf.mxu2  ;;  %v1182_v34 = vpack.c.bf16 %v1173_v8, %v1172_v56  ;;  %v1153_v38 = vpack.c.bf16 %v1139_v60, %v1138_v35  ;;  %v1180_v51 = vpack.c.bf16 %v1169_v55, %v1168_v53  ;;  %v1162_v42 = vmul.f32 %v2525_v5, %v3433_v1  ;;  %v2363_v35 = vld [vmem:[%s3730_s9 + $0x38] sm:$0xff] }
 0x88a   :  { %v1132_v9 = vadd.f32 %v1131_v10, %v1047_v31  ;;  %1206 = vrot.lane.b32.xlu2 %v1159_v7, %s2635_s26  ;;  %1202 = vrot.lane.b32.xlu0 %v1157_v14, %s2635_s26  ;;  %v2524_v31 = vld [vmem:[%s3751_s24 + $0x18] sm:$0xff]  ;;  %v2526_v7 = vld [vmem:[%s3751_s24 + $0x8] sm:$0xff] }
 0x88b   :  { %v1161_v14 = vmul.f32 %v2526_v7, %v1127_v25  ;;  %v2527_v10 = vld [vmem:[%s3751_s24] sm:$0xff]  ;;  %1381 = vmatpush.bf16.msra.mxu2 %v2363_v35  ;;  %s3753_s24 = sld [smem:[#allocation16_spill]] }
 0x88c   :  { %v1175_v28 = vmul.f32 %v2514_v18, %v1132_v9  ;;  %v1171_v50 = vmul.f32 %v2517_v24, %v1132_v9  ;;  %v1167_v43 = vmul.f32 %v2520_v54, %v1132_v9  ;;  %v1163_v27 = vmul.f32 %v2524_v31, %v1132_v9  ;;  %v2360_v31 = vld [vmem:[%s3730_s9 + $0x20] sm:$0xff] }
 0x88d   :  { %v1160_v20 = vmul.f32 %v2527_v10, %v1125_v30 }
 0x88e   :  { %v1183_v26 = vpack.c.bf16 %v1175_v28, %v1174_v17  ;;  %v1181_v41 = vpack.c.bf16 %v1171_v50, %v1170_v11  ;;  %v1179_v46 = vpack.c.bf16 %v1167_v43, %v1166_v2  ;;  %v1177_v45 = vpack.c.bf16 %v1163_v27, %v1162_v42  ;;  %v2529_v11 = vld [vmem:[%s3752_s14 + $0x8] sm:$0xff] }
 0x88f   :  { %v1176_v9 = vpack.c.bf16 %v1161_v14, %v1160_v20  ;;  %1382 = vmatpush.bf16.msra.mxu2 %v2362_v52 }
 0x890   :  { %1308 = vmatpush.bf16.msrb.mxu1 %v1183_v26 }
 0x892   :  { %1200 = vrot.lane.b32.xlu2 %v1156_v0, %s2635_s26  ;;  %1198 = vrot.lane.b32.xlu0 %v1155_v33, %s2635_s26 }
 0x894   :  { %1309 = vmatpush.bf16.msrb.mxu1 %v1182_v34  ;;  %v2528_v34 = vld [vmem:[%s3752_s14] sm:$0xff] }
 0x898   :  { %1310 = vmatpush.bf16.msrb.mxu1 %v1181_v41 }
 0x89a   :  { %1192 = vrot.lane.b32.xlu0 %v1152_v36, %s2635_s26  ;;  %1194 = vrot.lane.b32.xlu2 %v1153_v38, %s2635_s26  ;;  %s2015_s26 = sshll.u32 %s3740_s19, 4  ;;  %s2027_s19 = sshll.u32 %s2645_s18, 4  ;;  %s2016_s26 = int_to_ptr.hbm [resolvable:$true] %s2015_s26  ;;  %s2028_s19 = int_to_ptr.vmem [resolvable:$true] %s2027_s19 }
 0x89c   :  { %1311 = vmatpush.bf16.msrb.mxu1 %v1180_v51 }
 0x8a0   :  { %1312 = vmatpush.bf16.msrb.mxu1 %v1179_v46 }
 0x8a4   :  { %1313 = vmatpush.bf16.msrb.mxu1 %v1178_v16  ;;  %v2361_v16 = vld [vmem:[%s3730_s9 + $0x28] sm:$0xff]  ;;  %s2003_s9 = sshll.u32 %s2643_s27, 4  ;;  %s2004_s9 = int_to_ptr.vmem [resolvable:$true] %s2003_s9 }
 0x8a5   :  { %1383 = vmatpush.bf16.msra.mxu2 %v2361_v16 }
 0x8a8   :  { %1314 = vmatpush.bf16.msrb.mxu1 %v1177_v45 }
 0x8a9   :  { %1384 = vmatpush.bf16.msra.mxu2 %v2360_v31 }
 0x8ac   :  { %1315 = vmatpush.bf16.msrb.mxu1 %v1176_v9 }
 0x8e4   :  { %v1207_v17 = vpop.permute.xlu2 %1206 }
 0x8e5   :  { %v1236_v18 = vsel %vm89_vm0, %v1207_v17, 0 }
 0x8e6   :  { %1238 = vmatpush.bf16.xpose.msra.mxu3 %v1236_v18 }
 0x8ec   :  { %v1205_v28 = vpop.permute.xlu1 %1204  ;;  %v1201_v25 = vpop.permute.xlu2 %1200 }
 0x8ed   :  { %v1233_v1 = vsel %vm89_vm0, %v1205_v28, 0  ;;  %v1227_v26 = vsel %vm89_vm0, %v1201_v25, 0 }
 0x8ee   :  { %1239 = vmatpush.bf16.xpose.msra.mxu3 %v1233_v1 }
 0x8f4   :  { %v1197_v39 = vpop.permute.xlu1 %1196  ;;  %v1195_v8 = vpop.permute.xlu2 %1194 }
 0x8f5   :  { %v1221_v12 = vsel %vm89_vm0, %v1197_v39, 0  ;;  %v1218_v0 = vsel %vm89_vm0, %v1195_v8, 0 }
 0x8fc   :  { %v1203_v37 = vpop.permute.xlu0 %1202 }
 0x8fd   :  { %v1230_v47 = vsel %vm89_vm0, %v1203_v37, 0 }
 0x8fe   :  { %1240 = vmatpush.bf16.xpose.msra.mxu3 %v1230_v47 }
 0x904   :  { %v1199_v4 = vpop.permute.xlu0 %1198 }
 0x905   :  { %v1224_v30 = vsel %vm89_vm0, %v1199_v4, 0 }
 0x906   :  { %1241 = vmatpush.bf16.xpose.msra.mxu3 %v1227_v26 }
 0x90c   :  { %v1193_v33 = vpop.permute.xlu0 %1192 }
 0x90d   :  { %v1215_v29 = vsel %vm89_vm0, %v1193_v33, 0 }
 0x90e   :  { %1242 = vmatpush.bf16.xpose.msra.mxu3 %v1224_v30  ;;  %v3552_v30 = vld [vmem:[%s3734_s13 + $0x8] sm:$0x3f]  ;;  %s2644_s13 = smov 1.0  }
 0x90f   :  { %v1346_v39 = vperm.slane %v3552_v30, 0 }
 0x916   :  { %1243 = vmatpush.bf16.xpose.msra.mxu3 %v1221_v12 }
 0x91e   :  { %1244 = vmatpush.bf16.xpose.msra.mxu3 %v1218_v0 }
 0x926   :  { %1245 = vmatpush.bf16.xpose.msra.mxu3 %v1215_v29 }
 0x92d   :  { %2200 = vmatmul.msk.bf16.vlgmr.msra.gmra.mxu3 %vm89_vm0, %v1134_v57  ;;  %v2530_v57 = vld [vmem:[%s3752_s14 + $0x10] sm:$0xff] }
 0x92e   :  { %2380 = vmatpush.bf16.msrb.mxu3 %v2363_v35 }
 0x932   :  { %2381 = vmatpush.bf16.msrb.mxu3 %v2362_v52  ;;  %v2365_v52 = vld [vmem:[%s3731_s10 + $0x28] sm:$0xff] }
 0x936   :  { %2382 = vmatpush.bf16.msrb.mxu3 %v2361_v16 }
 0x93a   :  { %2383 = vmatpush.bf16.msrb.mxu3 %v2360_v31  ;;  %v2364_v31 = vld [vmem:[%s3731_s10 + $0x20] sm:$0xff] }
 0x93d   :  { %2201 = vmatmul.msk.bf16.gmra.mxu3 %vm89_vm0, %v1135_v6  ;;  %v2531_v6 = vld [vmem:[%s3752_s14 + $0x18] sm:$0xff]  ;;  %s2641_s14 = smov 128  }
 0x9b0   :  { %v1247_v56 = vpop.f32.mrf.mxu3 }
 0x9b1   :  { %v1248_v24 = vadd.f32 %v2528_v34, %v1247_v56 }
 0x9b3   :  { %1257 = vmax.xlane.f32.xlu1 %v1248_v24 }
 0x9b8   :  { %v1249_v50 = vpop.f32.mrf.mxu3 }
 0x9b9   :  { %v1250_v32 = vadd.f32 %v2529_v11, %v1249_v50 }
 0x9bb   :  { %1259 = vmax.xlane.f32.xlu2 %v1250_v32 }
 0x9c0   :  { %v1252_v3 = vpop.f32.mrf.mxu3 }
 0x9c1   :  { %v1253_v22 = vadd.f32 %v2530_v57, %v1252_v3 }
 0x9c3   :  { %1261 = vmax.xlane.f32.xlu0 %v1253_v22 }
 0x9c8   :  { %v1254_v62 = vpop.f32.mrf.mxu3 }
 0x9c9   :  { %v1255_v23 = vadd.f32 %v2531_v6, %v1254_v62 }
 0x9cb   :  { %1263 = vmax.xlane.f32.xlu1 %v1255_v23 }
 0xa26   :  { %v1258_v60 = vpop.xlane.xlu1 %1257 }
 0xa27   :  { %v1265_v41 = vsub.f32 %v1248_v24, %v1258_v60 }
 0xa29   :  { %v1269_v40 = vmul.f32 1.442695, %v1265_v41 }
 0xa2b   :  { %2458 = vpow2.f32 %v1269_v40 }
 0xa2e   :  { %v1260_v49 = vpop.xlane.xlu2 %1259 }
 0xa2f   :  { %v1266_v55 = vsub.f32 %v1250_v32, %v1260_v49 }
 0xa31   :  { %v2459_v36 = vpop.eup %2458  ;;  %v1271_v38 = vmul.f32 1.442695, %v1266_v55 }
 0xa32   :  { %1293 = vmatmul.f32.vlgmr.msrb.gmra.mxu0 %v2459_v36 }
 0xa33   :  { %2460 = vpow2.f32 %v1271_v38 }
 0xa36   :  { %v1262_v44 = vpop.xlane.xlu0 %1261 }
 0xa37   :  { %v1267_v53 = vsub.f32 %v1253_v22, %v1262_v44 }
 0xa39   :  { %v2461_v51 = vpop.eup %2460  ;;  %v1273_v54 = vmul.f32 1.442695, %v1267_v53 }
 0xa3a   :  { %1296 = vmatmul.f32.gmra.mxu0 %v2461_v51  ;;  %v1306_v43 = vpack.c.bf16 %v2461_v51, %v2459_v36 }
 0xa3b   :  { %2462 = vpow2.f32 %v1273_v54 }
 0xa3c   :  { %1316 = vmatmul.bf16.vlgmr.msrb.gmra.mxu1 %v1306_v43 }
 0xa3e   :  { %v1264_v63 = vpop.xlane.xlu1 %1263 }
 0xa3f   :  { %v1268_v2 = vsub.f32 %v1255_v23, %v1264_v63 }
 0xa41   :  { %v2463_v46 = vpop.eup %2462  ;;  %v1275_v58 = vmul.f32 1.442695, %v1268_v2 }
 0xa42   :  { %1299 = vmatmul.f32.gmra.mxu0 %v2463_v46 }
 0xa43   :  { %2464 = vpow2.f32 %v1275_v58  ;;  %v2366_v58 = vld [vmem:[%s3731_s10 + $0x30] sm:$0xff] }
 0xa49   :  { %v2465_v13 = vpop.eup %2464 }
 0xa4a   :  { %1302 = vmatmul.f32.gmra.mxu0 %v2465_v13  ;;  %v1307_v61 = vpack.c.bf16 %v2465_v13, %v2463_v46  ;;  %v2367_v46 = vld [vmem:[%s3731_s10 + $0x38] sm:$0xff]  ;;  %s3754_s10 = sld [smem:[#allocation17_spill]] }
 0xa4b   :  { %1548 = vmatpush.bf16.msra.mxu0 %v2367_v46  ;;  %v2373_v46 = vld [vmem:[%s3733_s12 + $0x68] sm:$0xff] }
 0xa4c   :  { %1321 = vmatmul.bf16.gmra.mxu1 %v1307_v61 }
 0xa4f   :  { %1549 = vmatpush.bf16.msra.mxu0 %v2366_v58  ;;  %v2372_v58 = vld [vmem:[%s3733_s12 + $0x60] sm:$0xff] }
 0xa53   :  { %1550 = vmatpush.bf16.msra.mxu0 %v2365_v52  ;;  %v2406_v52 = vld [vmem:[%s3732_s11 + $0x1] ss:$0 sm:$0xff] }
 0xa57   :  { %1551 = vmatpush.bf16.msra.mxu0 %v2364_v31 }
 0xaaf   :  { %v1294_v27 = vpop.f32.mrf.mxu0 }
 0xab0   :  { %2466 = vrcp.f32 %v1294_v27 }
 0xab6   :  { %v2467_v7 = vpop.eup %2466 }
 0xab7   :  { %v1297_v5 = vpop.f32.mrf.mxu0 }
 0xab8   :  { %2468 = vrcp.f32 %v1297_v5 }
 0xab9   :  { %v1317_v42 = vpop.f32.mrf.mxu1 }
 0xaba   :  { %v1331_v20 = vmul.f32 %v2467_v7, %v1317_v42 }
 0xabe   :  { %v2469_v14 = vpop.eup %2468 }
 0xabf   :  { %v1300_v45 = vpop.f32.mrf.mxu0 }
 0xac0   :  { %2470 = vrcp.f32 %v1300_v45 }
 0xac1   :  { %v1319_v10 = vpop.f32.mrf.mxu1 }
 0xac2   :  { %v1332_v9 = vmul.f32 %v2469_v14, %v1319_v10 }
 0xac4   :  { %v1335_v17 = vpack.c.bf16 %v1332_v9, %v1331_v20 }
 0xac6   :  { %2226 = vmatmul.msk.bf16.vlgmr.msra.gmra.mxu2 %vm89_vm0, %v1335_v17  ;;  %v2471_v1 = vpop.eup %2470 }
 0xac7   :  { %v1303_v18 = vpop.f32.mrf.mxu0 }
 0xac8   :  { %2472 = vrcp.f32 %v1303_v18 }
 0xac9   :  { %v1322_v28 = vpop.f32.mrf.mxu1 }
 0xaca   :  { %v1333_v25 = vmul.f32 %v2471_v1, %v1322_v28 }
 0xace   :  { %v2473_v37 = vpop.eup %2472 }
 0xad1   :  { %v1324_v47 = vpop.f32.mrf.mxu1 }
 0xad2   :  { %v1334_v26 = vmul.f32 %v2473_v37, %v1324_v47 }
 0xad4   :  { %v1336_v4 = vpack.c.bf16 %v1334_v26, %v1333_v25 }
 0xad6   :  { %2227 = vmatmul.msk.bf16.vlgmr.msrb.gmra.mxu3 %vm89_vm0, %v1336_v4 }
 0xb49   :  { %v1386_v12 = vpop.f32.mrf.mxu2 }
 0xb4a   :  { %v1387_v8 = vadd.f32 %v1386_v12, %v1346_v39 }
 0xb4c   :  { %v1396_v0 = vadd.f32 %v1387_v8, %v3382_v19 }
 0xb4e   :  { %v1400_v33 = vsel %vm89_vm0, %v1396_v0, 0.0 }
 0xb4f   :  { %1401 = vadd.xlane.f32.xlu2 %v1400_v33 }
 0xb51   :  { %v1388_v29 = vpop.f32.mrf.mxu2 }
 0xb52   :  { %v1389_v56 = vadd.f32 %v1388_v29, %v1346_v39 }
 0xb54   :  { %v1397_v34 = vadd.f32 %v1389_v56, %v3384_v59 }
 0xb56   :  { %v1403_v24 = vsel %vm89_vm0, %v1397_v34, 0.0 }
 0xb57   :  { %1404 = vadd.xlane.f32.xlu0 %v1403_v24 }
 0xb59   :  { %v1391_v50 = vpop.f32.mrf.mxu3 }
 0xb5a   :  { %v1392_v11 = vadd.f32 %v1391_v50, %v1346_v39 }
 0xb5c   :  { %v1398_v32 = vadd.f32 %v1392_v11, %v3392_v21  ;;  %v1493_v11 = vperm.slane %v3552_v30, 2 }
 0xb5e   :  { %v1406_v3 = vsel %vm89_vm0, %v1398_v32, 0.0 }
 0xb5f   :  { %1407 = vadd.xlane.f32.xlu1 %v1406_v3 }
 0xb61   :  { %v1393_v57 = vpop.f32.mrf.mxu3 }
 0xb62   :  { %v1394_v22 = vadd.f32 %v1393_v57, %v1346_v39 }
 0xb64   :  { %v1399_v19 = vadd.f32 %v1394_v22, %v3394_v48 }
 0xb66   :  { %v1409_v62 = vsel %vm89_vm0, %v1399_v19, 0.0 }
 0xb67   :  { %1410 = vadd.xlane.f32.xlu2 %v1409_v62 }
 0xbc2   :  { %v1402_v6 = vpop.xlane.xlu2 %1401 }
 0xbc3   :  { %v1412_v59 = vmul.f32 %v1402_v6, %v2775_v15 }
 0xbc5   :  { %v1416_v23 = vsub.f32 %v1396_v0, %v1412_v59  ;;  %v1488_v0 = vperm.slane %v3552_v30, 1 }
 0xbc7   :  { %v1420_v60 = vmul.f32 %v1416_v23, %v1416_v23 }
 0xbc9   :  { %v1424_v41 = vsel %vm89_vm0, %v1420_v60, 0.0 }
 0xbca   :  { %v1405_v40 = vpop.xlane.xlu0 %1404  ;;  %1425 = vadd.xlane.f32.xlu0 %v1424_v41 }
 0xbcb   :  { %v1413_v21 = vmul.f32 %v1405_v40, %v2775_v15 }
 0xbcd   :  { %v3566_v35 = vsub.f32 %v1397_v34, %v1413_v21 }
 0xbcf   :  { %v1421_v49 = vmul.f32 %v3566_v35, %v3566_v35 }
 0xbd1   :  { %v1427_v48 = vsel %vm89_vm0, %v1421_v49, 0.0 }
 0xbd2   :  { %1428 = vadd.xlane.f32.xlu1 %v1427_v48  ;;  %v1408_v55 = vpop.xlane.xlu1 %1407 }
 0xbd3   :  { %v1414_v36 = vmul.f32 %v1408_v55, %v2775_v15 }
 0xbd5   :  { %v3572_v38 = vsub.f32 %v1398_v32, %v1414_v36 }
 0xbd7   :  { %v1422_v44 = vmul.f32 %v3572_v38, %v3572_v38 }
 0xbd9   :  { %v1430_v53 = vsel %vm89_vm0, %v1422_v44, 0.0 }
 0xbda   :  { %v1411_v51 = vpop.xlane.xlu2 %1410  ;;  %1431 = vadd.xlane.f32.xlu2 %v1430_v53 }
 0xbdb   :  { %v1415_v54 = vmul.f32 %v1411_v51, %v2775_v15 }
 0xbdd   :  { %v3578_v43 = vsub.f32 %v1399_v19, %v1415_v54 }
 0xbdf   :  { %v1423_v63 = vmul.f32 %v3578_v43, %v3578_v43 }
 0xbe1   :  { %v1433_v2 = vsel %vm89_vm0, %v1423_v63, 0.0 }
 0xbe2   :  { %1434 = vadd.xlane.f32.xlu0 %v1433_v2 }
 0xc3d   :  { %v1426_v13 = vpop.xlane.xlu0 %1425 }
 0xc3e   :  { %v1436_v61 = vmul.f32 %v1426_v13, %v2775_v15  ;;  %v2371_v13 = vld [vmem:[%s3733_s12 + $0x58] sm:$0xff] }
 0xc40   :  { %v1440_v16 = vadd.f32 1e-12, %v1436_v61  ;;  %v2370_v61 = vld [vmem:[%s3733_s12 + $0x50] sm:$0xff] }
 0xc42   :  { %2474 = vrsqrt.f32 %v1440_v16  ;;  %vm1450_vm9 = vweird.f32 %v1440_v16 }
 0xc45   :  { %v1429_v27 = vpop.xlane.xlu1 %1428 }
 0xc46   :  { %v1437_v5 = vmul.f32 %v1429_v27, %v2775_v15 }
 0xc48   :  { %v2475_v42 = vpop.eup %2474  ;;  %v1441_v45 = vadd.f32 1e-12, %v1437_v5  ;;  %v2368_v5 = vld [vmem:[%s3733_s12 + $0x40] sm:$0xff] }
 0xc49   :  { %v1445_v7 = vmul.f32 %v2475_v42, %v1440_v16  ;;  %vm1451_vm8 = vweird.f32 %v2475_v42  ;;  %v2369_v16 = vld [vmem:[%s3733_s12 + $0x48] sm:$0xff] }
 0xc4a   :  { %2476 = vrsqrt.f32 %v1441_v45  ;;  %vm1452_vm10 = vmor %vm1450_vm9, %vm1451_vm8  ;;  %vm1460_vm12 = vweird.f32 %v1441_v45 }
 0xc4b   :  { %v1446_v14 = vmul.f32 %v2475_v42, %v1445_v7 }
 0xc4d   :  { %v1447_v10 = vmul.f32 0.5, %v1446_v14  ;;  %v1432_v20 = vpop.xlane.xlu2 %1431 }
 0xc4e   :  { %v1438_v9 = vmul.f32 %v1432_v20, %v2775_v15 }
 0xc4f   :  { %v1448_v17 = vsub.f32 1.5, %v1447_v10 }
 0xc50   :  { %v2477_v18 = vpop.eup %2476  ;;  %v1442_v28 = vadd.f32 1e-12, %v1438_v9 }
 0xc51   :  { %v1449_v1 = vmul.f32 %v2475_v42, %v1448_v17  ;;  %v1455_v37 = vmul.f32 %v2477_v18, %v1441_v45  ;;  %vm1461_vm11 = vweird.f32 %v2477_v18 }
 0xc52   :  { %2478 = vrsqrt.f32 %v1442_v28  ;;  %vm1462_vm13 = vmor %vm1460_vm12, %vm1461_vm11  ;;  %vm1470_vm15 = vweird.f32 %v1442_v28 }
 0xc53   :  { %v1456_v47 = vmul.f32 %v2477_v18, %v1455_v37  ;;  %v1453_v25 = vsel %vm1452_vm10, %v2475_v42, %v1449_v1 }
 0xc54   :  { %v1484_v33 = vmul.f32 %v1453_v25, %v1416_v23 }
 0xc55   :  { %v1457_v26 = vmul.f32 0.5, %v1456_v47  ;;  %v1435_v4 = vpop.xlane.xlu0 %1434 }
 0xc56   :  { %v1439_v39 = vmul.f32 %v1435_v4, %v2775_v15  ;;  %v1489_v32 = vmul.f32 %v1488_v0, %v1484_v33 }
 0xc57   :  { %v1458_v12 = vsub.f32 1.5, %v1457_v26 }
 0xc58   :  { %v2479_v8 = vpop.eup %2478  ;;  %v1443_v29 = vadd.f32 1e-12, %v1439_v39  ;;  %v3602_v6 = vadd.f32 %v1493_v11, %v1489_v32 }
 0xc59   :  { %v1459_v56 = vmul.f32 %v2477_v18, %v1458_v12  ;;  %v1465_v34 = vmul.f32 %v2479_v8, %v1442_v28  ;;  %vm1471_vm14 = vweird.f32 %v2479_v8 }
 0xc5a   :  { %2480 = vrsqrt.f32 %v1443_v29  ;;  %vm1472_vm1 = vmor %vm1470_vm15, %vm1471_vm14  ;;  %vm1480_vm3 = vweird.f32 %v1443_v29 }
 0xc5b   :  { %v1463_v24 = vsel %vm1462_vm13, %v2477_v18, %v1459_v56  ;;  %v1466_v50 = vmul.f32 %v2479_v8, %v1465_v34 }
 0xc5c   :  { %v1485_v3 = vmul.f32 %v1463_v24, %v3566_v35 }
 0xc5d   :  { %v1467_v57 = vmul.f32 0.5, %v1466_v50 }
 0xc5e   :  { %v1490_v22 = vmul.f32 %v1488_v0, %v1485_v3 }
 0xc5f   :  { %v1468_v19 = vsub.f32 1.5, %v1467_v57 }
 0xc60   :  { %v2481_v62 = vpop.eup %2480  ;;  %v3604_v59 = vadd.f32 %v1493_v11, %v1490_v22 }
 0xc61   :  { %v1469_v23 = vmul.f32 %v2479_v8, %v1468_v19  ;;  %v1475_v60 = vmul.f32 %v2481_v62, %v1443_v29  ;;  %vm1481_vm2 = vweird.f32 %v2481_v62 }
 0xc62   :  { %v1498_v41 = vpack.c.bf16 %v3604_v59, %v3602_v6  ;;  %vm1482_vm4 = vmor %vm1480_vm3, %vm1481_vm2  ;;  %vm1934_vm2 = vcmask 253952  }
 0xc63   :  { %v1476_v40 = vmul.f32 %v2481_v62, %v1475_v60  ;;  %v1473_v21 = vsel %vm1472_vm1, %v2479_v8, %v1469_v23 }
 0xc64   :  { %2253 = vmatmul.msk.bf16.vlgmr.msra.gmra.mxu0 %vm89_vm0, %v1498_v41  ;;  %v1486_v48 = vmul.f32 %v1473_v21, %v3572_v38  ;;  %v2375_v38 = vld [vmem:[%s3733_s12 + $0x78] sm:$0xff] }
 0xc65   :  { %v1477_v35 = vmul.f32 0.5, %v1476_v40  ;;  %1667 = vmatpush.bf16.msra.mxu1 %v2375_v38 }
 0xc66   :  { %v1491_v53 = vmul.f32 %v1488_v0, %v1486_v48 }
 0xc67   :  { %v1478_v49 = vsub.f32 1.5, %v1477_v35 }
 0xc68   :  { %v3611_v54 = vadd.f32 %v1493_v11, %v1491_v53  ;;  %v1618_v53 = vperm.slane %v3552_v30, 3 }
 0xc69   :  { %v1479_v55 = vmul.f32 %v2481_v62, %v1478_v49 }
 0xc6b   :  { %v1483_v36 = vsel %vm1482_vm4, %v2481_v62, %v1479_v55 }
 0xc6c   :  { %v1487_v44 = vmul.f32 %v1483_v36, %v3578_v43  ;;  %v2374_v43 = vld [vmem:[%s3733_s12 + $0x70] sm:$0xff] }
 0xc6d   :  { %1668 = vmatpush.bf16.msra.mxu1 %v2374_v43 }
 0xc6e   :  { %v1492_v51 = vmul.f32 %v1488_v0, %v1487_v44 }
 0xc70   :  { %v3613_v63 = vadd.f32 %v1493_v11, %v1492_v51 }
 0xc71   :  { %1669 = vmatpush.bf16.msra.mxu1 %v2373_v46 }
 0xc72   :  { %v1499_v2 = vpack.c.bf16 %v3613_v63, %v3611_v54 }
 0xc74   :  { %2254 = vmatmul.msk.bf16.gmra.mxu0 %vm89_vm0, %v1499_v2 }
 0xc75   :  { %1670 = vmatpush.bf16.msra.mxu1 %v2372_v58 }
 0xc79   :  { %1671 = vmatpush.bf16.msra.mxu1 %v2371_v13 }
 0xc7d   :  { %1672 = vmatpush.bf16.msra.mxu1 %v2370_v61 }
 0xc81   :  { %1673 = vmatpush.bf16.msra.mxu1 %v2369_v16 }
 0xc85   :  { %1674 = vmatpush.bf16.msra.mxu1 %v2368_v5 }
 0xce1   :  { %v1553_v31 = vpop.f32.mrf.mxu0 }
 0xce2   :  { %v1554_v27 = vadd.f32 %v2406_v52, %v1553_v31 }
 0xce4   :  { %v1563_v42 = vmul.f32 %v1554_v27, %v1554_v27 }
 0xce6   :  { %v1567_v45 = vmul.f32 %v1563_v42, %v1554_v27 }
 0xce8   :  { %v1571_v7 = vmul.f32 0.044715, %v1567_v45 }
 0xce9   :  { %v1555_v14 = vpop.f32.mrf.mxu0 }
 0xcea   :  { %v1575_v10 = vadd.f32 %v1571_v7, %v1554_v27  ;;  %v1556_v20 = vadd.f32 %v2406_v52, %v1555_v14 }
 0xcec   :  { %v1579_v9 = vmul.f32 0.7978846, %v1575_v10  ;;  %v1564_v17 = vmul.f32 %v1556_v20, %v1556_v20 }
 0xcee   :  { %v1568_v18 = vmul.f32 %v1564_v17, %v1556_v20  ;;  %2482 = vtanh.f32 %v1579_v9 }
 0xcf0   :  { %v1572_v28 = vmul.f32 0.044715, %v1568_v18 }
 0xcf1   :  { %v1558_v1 = vpop.f32.mrf.mxu0 }
 0xcf2   :  { %v1576_v37 = vadd.f32 %v1572_v28, %v1556_v20  ;;  %v1559_v47 = vadd.f32 %v2406_v52, %v1558_v1 }
 0xcf4   :  { %v1580_v25 = vmul.f32 0.7978846, %v1576_v37  ;;  %v1565_v26 = vmul.f32 %v1559_v47, %v1559_v47  ;;  %v2483_v4 = vpop.eup %2482 }
 0xcf5   :  { %v1587_v8 = vadd.f32 1.0, %v2483_v4 }
 0xcf6   :  { %2484 = vtanh.f32 %v1580_v25  ;;  %v1569_v39 = vmul.f32 %v1565_v26, %v1559_v47 }
 0xcf7   :  { %v1591_v50 = vmul.f32 0.5, %v1587_v8 }
 0xcf8   :  { %v1573_v12 = vmul.f32 0.044715, %v1569_v39 }
 0xcf9   :  { %v1560_v0 = vpop.f32.mrf.mxu0  ;;  %v1595_v22 = vmul.f32 %v1591_v50, %v1554_v27  ;;  %v2376_v50 = vld [vmem:[#allocation3] sm:$0xff] }
 0xcfa   :  { %v1577_v33 = vadd.f32 %v1573_v12, %v1559_v47  ;;  %v1561_v29 = vadd.f32 %v2406_v52, %v1560_v0  ;;  %v2379_v0 = vld [vmem:[#allocation3 + $0x18] sm:$0xff] }
 0xcfb   :  { %1836 = vmatpush.bf16.msrb.mxu2 %v2379_v0 }
 0xcfc   :  { %v2485_v56 = vpop.eup %2484  ;;  %v1566_v34 = vmul.f32 %v1561_v29, %v1561_v29  ;;  %v1581_v24 = vmul.f32 0.7978846, %v1577_v33  ;;  %v2378_v33 = vld [vmem:[#allocation3 + $0x10] sm:$0xff] }
 0xcfd   :  { %v1588_v11 = vadd.f32 1.0, %v2485_v56 }
 0xcfe   :  { %v1570_v32 = vmul.f32 %v1566_v34, %v1561_v29  ;;  %2486 = vtanh.f32 %v1581_v24  ;;  %v2377_v34 = vld [vmem:[#allocation3 + $0x8] sm:$0xff] }
 0xcff   :  { %v1592_v3 = vmul.f32 0.5, %v1588_v11  ;;  %1837 = vmatpush.bf16.msrb.mxu2 %v2378_v33 }
 0xd00   :  { %v1574_v57 = vmul.f32 0.044715, %v1570_v32 }
 0xd01   :  { %v1596_v19 = vmul.f32 %v1592_v3, %v1556_v20 }
 0xd02   :  { %v1578_v62 = vadd.f32 %v1574_v57, %v1561_v29 }
 0xd03   :  { %v1599_v23 = vpack.c.bf16 %v1596_v19, %v1595_v22  ;;  %1838 = vmatpush.bf16.msrb.mxu2 %v2377_v34 }
 0xd04   :  { %v1582_v60 = vmul.f32 0.7978846, %v1578_v62  ;;  %v2487_v41 = vpop.eup %2486 }
 0xd05   :  { %1675 = vmatmul.bf16.vlgmr.msra.gmra.mxu1 %v1599_v23  ;;  %v1589_v40 = vadd.f32 1.0, %v2487_v41 }
 0xd06   :  { %2488 = vtanh.f32 %v1582_v60 }
 0xd07   :  { %v1593_v49 = vmul.f32 0.5, %v1589_v40  ;;  %1839 = vmatpush.bf16.msrb.mxu2 %v2376_v50 }
 0xd09   :  { %v1597_v55 = vmul.f32 %v1593_v49, %v1559_v47 }
 0xd0c   :  { %v2489_v21 = vpop.eup %2488 }
 0xd0d   :  { %v1590_v35 = vadd.f32 1.0, %v2489_v21 }
 0xd0f   :  { %v1594_v48 = vmul.f32 0.5, %v1590_v35 }
 0xd11   :  { %v1598_v36 = vmul.f32 %v1594_v48, %v1561_v29 }
 0xd13   :  { %v1600_v44 = vpack.c.bf16 %v1598_v36, %v1597_v55 }
 0xd15   :  { %1680 = vmatmul.bf16.gmra.mxu1 %v1600_v44 }
 0xd82   :  { %v1676_v51 = vpop.f32.mrf.mxu1 }
 0xd83   :  { %v1677_v2 = vadd.f32 %v1676_v51, %v1618_v53 }
 0xd85   :  { %v1686_v38 = vadd.f32 %v1677_v2, %v3602_v6 }
 0xd87   :  { %v1690_v43 = vsel %vm89_vm0, %v1686_v38, 0.0 }
 0xd88   :  { %1691 = vadd.xlane.f32.xlu1 %v1690_v43 }
 0xd8a   :  { %v1678_v46 = vpop.f32.mrf.mxu1 }
 0xd8b   :  { %v1679_v58 = vadd.f32 %v1678_v46, %v1618_v53 }
 0xd8d   :  { %v1687_v13 = vadd.f32 %v1679_v58, %v3604_v59 }
 0xd8f   :  { %v1693_v61 = vsel %vm89_vm0, %v1687_v13, 0.0 }
 0xd90   :  { %1694 = vadd.xlane.f32.xlu2 %v1693_v61 }
 0xd92   :  { %v1681_v52 = vpop.f32.mrf.mxu1 }
 0xd93   :  { %v1682_v16 = vadd.f32 %v1681_v52, %v1618_v53 }
 0xd95   :  { %v1688_v31 = vadd.f32 %v1682_v16, %v3611_v54  ;;  %v1783_v16 = vperm.slane %v3552_v30, 5 }
 0xd97   :  { %v1696_v27 = vsel %vm89_vm0, %v1688_v31, 0.0 }
 0xd98   :  { %1697 = vadd.xlane.f32.xlu0 %v1696_v27 }
 0xd9a   :  { %v1683_v5 = vpop.f32.mrf.mxu1 }
 0xd9b   :  { %v1684_v42 = vadd.f32 %v1683_v5, %v1618_v53 }
 0xd9d   :  { %v1689_v6 = vadd.f32 %v1684_v42, %v3613_v63 }
 0xd9f   :  { %v1699_v45 = vsel %vm89_vm0, %v1689_v6, 0.0 }
 0xda0   :  { %1700 = vadd.xlane.f32.xlu1 %v1699_v45 }
 0xdfb   :  { %v1692_v7 = vpop.xlane.xlu1 %1691 }
 0xdfc   :  { %v1702_v59 = vmul.f32 %v1692_v7, %v2775_v15 }
 0xdfe   :  { %v1706_v14 = vsub.f32 %v1686_v38, %v1702_v59  ;;  %v1778_v38 = vperm.slane %v3552_v30, 4 }
 0xe00   :  { %v1710_v10 = vmul.f32 %v1706_v14, %v1706_v14 }
 0xe02   :  { %v1714_v20 = vsel %vm89_vm0, %v1710_v10, 0.0 }
 0xe03   :  { %v1695_v9 = vpop.xlane.xlu2 %1694  ;;  %1715 = vadd.xlane.f32.xlu2 %v1714_v20 }
 0xe04   :  { %v1703_v54 = vmul.f32 %v1695_v9, %v2775_v15 }
 0xe06   :  { %v3657_v17 = vsub.f32 %v1687_v13, %v1703_v54 }
 0xe08   :  { %v1711_v18 = vmul.f32 %v3657_v17, %v3657_v17 }
 0xe0a   :  { %v1717_v63 = vsel %vm89_vm0, %v1711_v18, 0.0 }
 0xe0b   :  { %v1698_v28 = vpop.xlane.xlu0 %1697  ;;  %1718 = vadd.xlane.f32.xlu0 %v1717_v63 }
 0xe0c   :  { %v1704_v1 = vmul.f32 %v1698_v28, %v2775_v15 }
 0xe0e   :  { %v3663_v37 = vsub.f32 %v1688_v31, %v1704_v1 }
 0xe10   :  { %v1712_v47 = vmul.f32 %v3663_v37, %v3663_v37 }
 0xe12   :  { %v1720_v25 = vsel %vm89_vm0, %v1712_v47, 0.0 }
 0xe13   :  { %1721 = vadd.xlane.f32.xlu1 %v1720_v25  ;;  %v1701_v26 = vpop.xlane.xlu1 %1700 }
 0xe14   :  { %v1705_v4 = vmul.f32 %v1701_v26, %v2775_v15 }
 0xe16   :  { %v3669_v39 = vsub.f32 %v1689_v6, %v1705_v4 }
 0xe18   :  { %v1713_v12 = vmul.f32 %v3669_v39, %v3669_v39 }
 0xe1a   :  { %v1723_v8 = vsel %vm89_vm0, %v1713_v12, 0.0  ;;  %v2407_v12 = vld [vmem:[%s3736_s15] ss:$0 sm:$0xff]  ;;  %s2029_s15 = sshll.u32 %s3741_s20, 4  ;;  %s2030_s15 = int_to_ptr.hbm [resolvable:$true] %s2029_s15 }
 0xe1b   :  { %1724 = vadd.xlane.f32.xlu2 %v1723_v8 }
 0xe76   :  { %v1716_v29 = vpop.xlane.xlu2 %1715 }
 0xe77   :  { %v1726_v56 = vmul.f32 %v1716_v29, %v2775_v15 }
 0xe79   :  { %v1730_v24 = vadd.f32 1e-12, %v1726_v56 }
 0xe7b   :  { %2490 = vrsqrt.f32 %v1730_v24  ;;  %vm1740_vm6 = vweird.f32 %v1730_v24 }
 0xe7e   :  { %v1719_v11 = vpop.xlane.xlu0 %1718 }
 0xe7f   :  { %v1727_v32 = vmul.f32 %v1719_v11, %v2775_v15 }
 0xe81   :  { %v2491_v3 = vpop.eup %2490  ;;  %v1731_v57 = vadd.f32 1e-12, %v1727_v32 }
 0xe82   :  { %v1735_v22 = vmul.f32 %v2491_v3, %v1730_v24  ;;  %vm1741_vm5 = vweird.f32 %v2491_v3 }
 0xe83   :  { %2492 = vrsqrt.f32 %v1731_v57  ;;  %vm1742_vm7 = vmor %vm1740_vm6, %vm1741_vm5  ;;  %vm1750_vm9 = vweird.f32 %v1731_v57 }
 0xe84   :  { %v1736_v19 = vmul.f32 %v2491_v3, %v1735_v22 }
 0xe86   :  { %v1737_v62 = vmul.f32 0.5, %v1736_v19  ;;  %v1722_v23 = vpop.xlane.xlu1 %1721 }
 0xe87   :  { %v1728_v60 = vmul.f32 %v1722_v23, %v2775_v15 }
 0xe88   :  { %v1738_v41 = vsub.f32 1.5, %v1737_v62 }
 0xe89   :  { %v2493_v40 = vpop.eup %2492  ;;  %v1732_v21 = vadd.f32 1e-12, %v1728_v60 }
 0xe8a   :  { %v1739_v35 = vmul.f32 %v2491_v3, %v1738_v41  ;;  %v1745_v49 = vmul.f32 %v2493_v40, %v1731_v57  ;;  %vm1751_vm8 = vweird.f32 %v2493_v40 }
 0xe8b   :  { %2494 = vrsqrt.f32 %v1732_v21  ;;  %vm1752_vm10 = vmor %vm1750_vm9, %vm1751_vm8  ;;  %vm1760_vm12 = vweird.f32 %v1732_v21  ;;  %vm1996_vm8 = vcmask 0  }
 0xe8c   :  { %v1746_v48 = vmul.f32 %v2493_v40, %v1745_v49  ;;  %v1743_v55 = vsel %vm1742_vm7, %v2491_v3, %v1739_v35 }
 0xe8d   :  { %v1774_v43 = vmul.f32 %v1743_v55, %v1706_v14 }
 0xe8e   :  { %v1747_v36 = vmul.f32 0.5, %v1746_v48  ;;  %v1725_v44 = vpop.xlane.xlu2 %1724 }
 0xe8f   :  { %v1729_v53 = vmul.f32 %v1725_v44, %v2775_v15  ;;  %v1779_v31 = vmul.f32 %v1778_v38, %v1774_v43 }
 0xe90   :  { %v1748_v51 = vsub.f32 1.5, %v1747_v36 }
 0xe91   :  { %v2495_v2 = vpop.eup %2494  ;;  %v1733_v46 = vadd.f32 1e-12, %v1729_v53  ;;  %v1784_v45 = vadd.f32 %v1783_v16, %v1779_v31 }
 0xe92   :  { %v1749_v58 = vmul.f32 %v2493_v40, %v1748_v51  ;;  %v1755_v13 = vmul.f32 %v2495_v2, %v1732_v21  ;;  %vm1761_vm11 = vweird.f32 %v2495_v2 }
 0xe93   :  { %2496 = vrsqrt.f32 %v1733_v46  ;;  %vm1762_vm13 = vmor %vm1760_vm12, %vm1761_vm11  ;;  %vm1770_vm15 = vweird.f32 %v1733_v46 }
 0xe94   :  { %v1753_v61 = vsel %vm1752_vm10, %v2493_v40, %v1749_v58  ;;  %v1756_v52 = vmul.f32 %v2495_v2, %v1755_v13  ;;  %v1892_v13 = vld [vmem:[#allocation2] sm:$0x1] }
 0xe95   :  { %v1775_v27 = vmul.f32 %v1753_v61, %v3657_v17  ;;  %v2638_v61 = vmov 0  }
 0xe96   :  { %v1757_v15 = vmul.f32 0.5, %v1756_v52  ;;  %2402 = vset.pattern.permute.xlu0 %v2638_v61  ;;  %v1941_v52 = vld [vmem:[%s3753_s24] sm:$0x1] }
 0xe97   :  { %v1780_v5 = vmul.f32 %v1778_v38, %v1775_v27  ;;  %1895 = vperm.xlu0 %2402, %v1892_v13   ;;  %vm1942_vm3 = vcmp.ne.f32.partialorder %v1941_v52, 0.0 }
 0xe98   :  { %v1758_v42 = vsub.f32 1.5, %v1757_v15  ;;  %v2639_v15 = vmov 0.0  }
 0xe99   :  { %v2497_v6 = vpop.eup %2496  ;;  %v1785_v7 = vadd.f32 %v1783_v16, %v1780_v5  ;;  %v2327_v5 = vsel %vm1942_vm3, 1.0, %v2639_v15 }
 0xe9a   :  { %v1759_v59 = vmul.f32 %v2495_v2, %v1758_v42  ;;  %v1765_v14 = vmul.f32 %v2497_v6, %v1733_v46  ;;  %vm1771_vm14 = vweird.f32 %v2497_v6  ;;  %v1956_v42 = vsel %vm1934_vm2, %v2327_v5, 0.0 }
 0xe9b   :  { %v1788_v10 = vpack.c.bf16 %v1785_v7, %v1784_v45  ;;  %vm1772_vm1 = vmor %vm1770_vm15, %vm1771_vm14  ;;  %1957 = vadd.xlane.f32.xlu1 %v1956_v42 }
 0xe9c   :  { %v1766_v20 = vmul.f32 %v2497_v6, %v1765_v14  ;;  %v1763_v9 = vsel %vm1762_vm13, %v2495_v2, %v1759_v59 }
 0xe9d   :  { %2319 = vmatmul.msk.bf16.vlgmr.msrb.gmra.mxu2 %vm89_vm0, %v1788_v10  ;;  %v1776_v17 = vmul.f32 %v1763_v9, %v3663_v37 }
 0xe9e   :  { %v1767_v30 = vmul.f32 0.5, %v1766_v20  ;;  %v1891_v20 = vld [vmem:[%s3737_s16] sm:$0x1] }
 0xe9f   :  { %v1781_v1 = vmul.f32 %v1778_v38, %v1776_v17 }
 0xea0   :  { %v1768_v54 = vsub.f32 1.5, %v1767_v30 }
 0xea1   :  { %v1786_v25 = vadd.f32 %v1783_v16, %v1781_v1 }
 0xea2   :  { %v1769_v18 = vmul.f32 %v2497_v6, %v1768_v54 }
 0xea4   :  { %v1773_v63 = vsel %vm1772_vm1, %v2497_v6, %v1769_v18 }
 0xea5   :  { %v1777_v28 = vmul.f32 %v1773_v63, %v3669_v39 }
 0xea7   :  { %v1782_v47 = vmul.f32 %v1778_v38, %v1777_v28 }
 0xea9   :  { %v1787_v26 = vadd.f32 %v1783_v16, %v1782_v47 }
 0xeab   :  { %v1789_v4 = vpack.c.bf16 %v1787_v26, %v1786_v25 }
 0xead   :  { %2320 = vmatmul.msk.bf16.gmra.mxu2 %vm89_vm0, %v1789_v4 }
 0xf09   :  { %v1896_v9 = vpop.permute.xlu0 %1895 }
 0xf0a   :  { %v1898_v30 = vperm.slane %v1896_v9, 0 }
 0xf0e   :  { %v1958_v17 = vpop.xlane.xlu1 %1957 }
 0xf0f   :  { %v1959_v63 = vrot.slane %v1958_v17, 4 }
 0xf11   :  { %v1960_v1 = vadd.f32 %v1959_v63, %v1958_v17 }
 0xf13   :  { %v1961_v25 = vrot.slane %v1960_v1, 2 }
 0xf15   :  { %v1962_v4 = vadd.f32 %v1961_v25, %v1960_v1 }
 0xf20   :  { %v1841_v8 = vpop.f32.mrf.mxu2 }
 0xf21   :  { %v1842_v0 = vadd.f32 %v2407_v12, %v1841_v8 }
 0xf23   :  { %v1851_v37 = vmul.f32 %v1842_v0, %v1842_v0 }
 0xf25   :  { %v1855_v33 = vmul.f32 %v1851_v37, %v1842_v0  ;;  %v1937_v37 = vld [vmem:[%s3726_s5] sm:$0x1] }
 0xf27   :  { %v1859_v29 = vmul.f32 0.044715, %v1855_v33 }
 0xf28   :  { %v1843_v56 = vpop.f32.mrf.mxu2 }
 0xf29   :  { %v1863_v34 = vadd.f32 %v1859_v29, %v1842_v0  ;;  %v1844_v24 = vadd.f32 %v2407_v12, %v1843_v56 }
 0xf2b   :  { %v1867_v39 = vmul.f32 0.7978846, %v1863_v34  ;;  %v1852_v50 = vmul.f32 %v1844_v24, %v1844_v24 }
 0xf2d   :  { %2498 = vtanh.f32 %v1867_v39  ;;  %v1856_v11 = vmul.f32 %v1852_v50, %v1844_v24 }
 0xf2f   :  { %v1860_v32 = vmul.f32 0.044715, %v1856_v11 }
 0xf30   :  { %v1846_v3 = vpop.f32.mrf.mxu2 }
 0xf31   :  { %v1864_v57 = vadd.f32 %v1860_v32, %v1844_v24  ;;  %v1847_v22 = vadd.f32 %v2407_v12, %v1846_v3 }
 0xf33   :  { %v2499_v19 = vpop.eup %2498  ;;  %v1868_v62 = vmul.f32 0.7978846, %v1864_v57  ;;  %v1853_v23 = vmul.f32 %v1847_v22, %v1847_v22 }
 0xf34   :  { %v1875_v60 = vadd.f32 1.0, %v2499_v19 }
 0xf35   :  { %2500 = vtanh.f32 %v1868_v62  ;;  %v1857_v41 = vmul.f32 %v1853_v23, %v1847_v22 }
 0xf36   :  { %v1879_v40 = vmul.f32 0.5, %v1875_v60 }
 0xf37   :  { %v1861_v21 = vmul.f32 0.044715, %v1857_v41 }
 0xf38   :  { %v1848_v35 = vpop.f32.mrf.mxu2  ;;  %v1883_v49 = vmul.f32 %v1879_v40, %v1842_v0  ;;  %v1936_v0 = vld [vmem:[%s3754_s10] sm:$0x1] }
 0xf39   :  { %v1865_v48 = vadd.f32 %v1861_v21, %v1847_v22  ;;  %v1849_v55 = vadd.f32 %v2407_v12, %v1848_v35  ;;  %v1963_v12 = vrot.slane %v1962_v4, 1 }
 0xf3a   :  { %1887 = vst.msk [vmem:[#allocation7] sm:$0xff] %vm89_vm0, %v1883_v49 }
 0xf3b   :  { %v2501_v36 = vpop.eup %2500  ;;  %v1869_v44 = vmul.f32 0.7978846, %v1865_v48  ;;  %v1854_v53 = vmul.f32 %v1849_v55, %v1849_v55  ;;  %v1964_v8 = vadd.f32 %v1963_v12, %v1962_v4 }
 0xf3c   :  { %v1876_v51 = vadd.f32 1.0, %v2501_v36 }
 0xf3d   :  { %2502 = vtanh.f32 %v1869_v44  ;;  %v1858_v2 = vmul.f32 %v1854_v53, %v1849_v55  ;;  %2384 = vpush %v1964_v8 }
 0xf3e   :  { %v1880_v38 = vmul.f32 0.5, %v1876_v51 }
 0xf3f   :  { %v1862_v43 = vmul.f32 0.044715, %v1858_v2 }
 0xf40   :  { %v1884_v46 = vmul.f32 %v1880_v38, %v1844_v24 }
 0xf41   :  { %v1866_v58 = vadd.f32 %v1862_v43, %v1849_v55 }
 0xf42   :  { %1888 = vst.msk [vmem:[#allocation7 + $0x8] sm:$0xff] %vm89_vm0, %v1884_v46 }
 0xf43   :  { %v2503_v16 = vpop.eup %2502  ;;  %v1870_v31 = vmul.f32 0.7978846, %v1866_v58 }
 0xf44   :  { %v1877_v27 = vadd.f32 1.0, %v2503_v16 }
 0xf45   :  { %2504 = vtanh.f32 %v1870_v31 }
 0xf46   :  { %v1881_v6 = vmul.f32 0.5, %v1877_v27 }
 0xf48   :  { %v1885_v45 = vmul.f32 %v1881_v6, %v1847_v22 }
 0xf4a   :  { %1889 = vst.msk [vmem:[#allocation7 + $0x10] sm:$0xff] %vm89_vm0, %v1885_v45 }
 0xf4b   :  { %v2505_v7 = vpop.eup %2504 }
 0xf4c   :  { %v1878_v59 = vadd.f32 1.0, %v2505_v7 }
 0xf4e   :  { %v1882_v14 = vmul.f32 0.5, %v1878_v59 }
 0xf50   :  { %v1886_v10 = vmul.f32 %v1882_v14, %v1849_v55 }
 0xf52   :  { %1890 = vst.msk [vmem:[#allocation7 + $0x18] sm:$0xff] %vm89_vm0, %v1886_v10  ;;  %2321 = vmatpush.xpose.msk.msra.mxu3 %vm89_vm0, %v1886_v10 }
 0xf53   :  { %2021 = dma.vmem_to_hbm [thread:$0]  %s2014_s1, 512, %s2016_s26, [#allocation8], %s2641_s14, %s2641_s14, %s2642_s23  }
 0xf56   :  { %2322 = vmatpush.xpose.msk.msra.mxu3 %vm89_vm0, %v1885_v45 }
 0xf5a   :  { %2323 = vmatpush.xpose.msk.msra.mxu3 %vm89_vm0, %v1884_v46 }
 0xf5e   :  { %2324 = vmatpush.xpose.msk.msra.mxu3 %vm89_vm0, %v1883_v49 }
 0xf61   :  { %2325 = vmatmul.msk.f32.vlgmr.msra.gmra.mxu3 %vm89_vm0, %v1891_v20  ;;  %vm1938_vm0 = vcmp.ne.s32.totalorder %v1936_v0, %v1937_v37 }
 0xf62   :  { %v2326_v56 = vsel %vm1938_vm0, 1.0, %v2639_v15 }
 0xf6e   :  { %s2385_s6 = spop %2384 }
 0xf6f   :  { %s1966_s17 = smax.f32 %s2644_s13, %s2385_s6 }
 0xf70   :  { %v1978_v22 = vstv %s1966_s17 }
 0xf71   :  { %vm1984_vm4 = vweird.f32 %v1978_v22  ;;  %v1990_v49 = vand.u32 2147483648, %v1978_v22  ;;  %v1988_v55 = vand.u32 2147483647, %v1978_v22 }
 0xf73   :  { %v1991_v53 = vor.u32 1.1754944e-38, %v1990_v49  ;;  %vm1989_vm7 = vcmp.eq.f32.partialorder %v1988_v55, 8.507059e+37 }
 0xfe4   :  { %v1931_v54 = vpop.f32.mrf.mxu3 }
 0xfe5   :  { %v1932_v18 = vadd.f32 %v1931_v54, %v1898_v30 }
 0xfe7   :  { %v1948_v28 = vand.u32 2147483647, %v1932_v18  ;;  %1935 = vst.msk [vmem:[#allocation6] sm:$0x1] %vm1934_vm2, %v1932_v18  ;;  %v1945_v34 = vmax.f32 %v1932_v18, 0.0  ;;  %v1946_v24 = vmul.f32 %v2326_v56, %v1932_v18 }
 0xfe8   :  { %2008 = dma.vmem_to_hbm [thread:$0]  %s2004_s9, 16, %s2006_s3, [#allocation5]  }
 0xfe9   :  { %v1949_v47 = vsub.f32 0.0, %v1948_v28  ;;  %v1947_v50 = vsub.f32 %v1945_v34, %v1946_v24 }
 0xfeb   :  { %v1950_v26 = vmul.f32 1.442695, %v1949_v47 }
 0xfed   :  { %2506 = vpow2.f32 %v1950_v26 }
 0xff3   :  { %v2507_v33 = vpop.eup %2506 }
 0xff4   :  { %v1952_v29 = vadd.f32 1.0, %v2507_v33 }
 0xff6   :  { %2508 = vlog2.f32 %v1952_v29 }
 0xff7   :  { %2510 = vrcp.f32 %v1978_v22 }
 0xffc   :  { %v2509_v39 = vpop.eup %2508 }
 0xffd   :  { %v1954_v11 = vmul.f32 0.6931472, %v2509_v39  ;;  %v2511_v19 = vpop.eup %2510 }
 0xffe   :  { %v1980_v62 = vmul.f32 %v2511_v19, %v1978_v22  ;;  %vm1985_vm5 = vweird.f32 %v2511_v19 }
 0xfff   :  { %v1955_v32 = vadd.f32 %v1954_v11, %v1947_v50  ;;  %vm1986_vm6 = vmor %vm1984_vm4, %vm1985_vm5 }
0x1000   :  { %v1981_v23 = vsub.f32 1.0, %v1980_v62 }
0x1001   :  { %v1967_v3 = vmul.f32 %v2327_v5, %v1955_v32 }
0x1002   :  { %v1982_v40 = vmul.f32 %v2511_v19, %v1981_v23 }
0x1003   :  { %v1968_v57 = vsel %vm1934_vm2, %v1967_v3, 0.0 }
0x1004   :  { %1969 = vadd.xlane.f32.xlu2 %v1968_v57  ;;  %v1983_v48 = vadd.f32 %v2511_v19, %v1982_v40 }
0x1006   :  { %v1987_v51 = vsel %vm1986_vm6, %v2511_v19, %v1983_v48 }
0x1007   :  { %v1992_v38 = vsel %vm1989_vm7, %v1991_v53, %v1987_v51 }
0x1077   :  { %v1970_v60 = vpop.xlane.xlu2 %1969 }
0x1078   :  { %v1971_v41 = vrot.slane %v1970_v60, 4 }
0x107a   :  { %v1972_v21 = vadd.f32 %v1971_v41, %v1970_v60 }
0x107c   :  { %v1973_v35 = vrot.slane %v1972_v21, 2 }
0x107e   :  { %v1974_v36 = vadd.f32 %v1973_v35, %v1972_v21 }
0x1080   :  { %v1975_v44 = vrot.slane %v1974_v36, 1 }
0x1082   :  { %v1976_v2 = vadd.f32 %v1975_v44, %v1974_v36 }
0x1084   :  { %2386 = vpush %v1976_v2 }
0x1085   :  { %2388 = vpush %v1992_v38 }
0x10b5   :  { %s2387_s28 = spop %2386 }
0x10b6   :  { %s2389_s4 = spop %2388 }
0x10b7   :  { %s1994_s24 = smul.f32 %s2389_s4, %s2387_s28 }
0x10b9   :  { %v1995_v43 = vstv %s1994_s24 }
0x10ba   :  { %1997 = vst.msk [vmem:[#allocation9] sm:$0x1] %vm1996_vm8, %v1995_v43 }
0x10bb   :  { %2032 = dma.vmem_to_hbm [thread:$0]  %s2028_s19, 16, %s2030_s15, [#allocation8]  }
0x10bc   :  { %2630 = dma.done.wait [#allocation5], 16  }
0x10bd   :  { %2631 = vsyncadd [#allocation5], 4294967280 }
0x10be   :  { %2632 = dma.done.wait [#allocation8], 528  }
0x10bf   :  { %2633 = vsyncadd [#allocation8], 4294966768 }
0x10c0   :  { %2045 = vsyncpa [#allocation4], 1 }
0x10c1   :  { %2046 = vsyncpa [#allocation5], 1 }
0x10c2   :  { %2047 = vsyncpa [#allocation8], 1 }

</bundles_post_ra>
